<compile_context>
chip_gen: v7x
topology: tpu7x:2x2x1
jax: 0.10.0
libtpu: 0.0.40
codegen_flags: <defaults>
</compile_context>

<pallas_src>
import functools

import jax
import jax.numpy as jnp
from jax import lax
from jax.experimental import pallas as pl
from jax.experimental.pallas import tpu as pltpu

HIDDEN = 128
FC_MID = 64
IN_FEAT = 6
GATES = 4 * HIDDEN


def _device_kind() -> str:
    try:
        return jax.devices()[0].device_kind.lower()
    except Exception:
        return ""


def _plan(B: int, T: int, kind: str):
    """Pick (b_blk, chunk, unroll, vmem_limit_bytes) for the current TPU generation."""
    two_tc = "v7" in kind                       # v7x: 2 TensorCores per chip
    v5 = "v5" in kind
    v6 = "v6" in kind
    mxu_m = 128 if v5 else 256                  # MXU M width: v5e 128, v6e/v7x 256

    # --- batch block ---
    if B % mxu_m == 0 and B // mxu_m >= (2 if two_tc else 1):
        b_blk = mxu_m                           # fill the MXU M dimension
    elif B % 128 == 0 and B // 128 >= 2:
        b_blk = 128
    elif two_tc and B >= 32 and B % 32 == 0:
        b_blk = B // 2                          # >=2 blocks so the 2nd TC isn't idle
    else:
        b_blk = B

    # --- time chunk (timesteps per grid step) ---
    max_chunk = 64 if v6 else 32                # v6e: 128 MiB VMEM allows bigger chunks
    chunk = min(max_chunk, T)

    # --- VMEM budget (scoped): keep well under physical (v7x: 64 MiB/TC) ---
    vmem_cap = (96 << 20) if v6 else (40 << 20)

    def need(ch):
        return (2 * ch * b_blk * GATES * 2      # gx double buffer (bf16)
                + 2 * HIDDEN * GATES * 2        # W_hh double buffer (bf16)
                + 2 * b_blk * HIDDEN * 4        # h/c scratch (f32)
                + 2 * b_blk * HIDDEN * 4)       # output double buffer (f32)

    while chunk > 8 and need(chunk) > vmem_cap:
        chunk = max(8, chunk // 2)

    unroll = min(8, chunk)
    vmem_limit = int(min(max(need(chunk) + (4 << 20), 16 << 20), 100 << 20))
    return b_blk, chunk, unroll, vmem_limit


def _lstm_chunk_kernel(gx_ref, whh_ref, h_out_ref, h_scr, c_scr,
                       *, chunk, seq_len, mask_tail, unroll):
    """One grid step = `chunk` LSTM timesteps for one batch block.

    gx_ref : (chunk, B_blk, 4H) bf16  precomputed x_t @ W_ih^T + (b_ih + b_hh)
    whh_ref: (H, 4H)            bf16  recurrent weight (resident)
    h_out  : (B_blk, H)         f32   hidden state after the last valid timestep
    """
    c_idx = pl.program_id(1)                   # time-chunk index (recurrent axis)
    last = pl.num_programs(1) - 1

    @pl.when(c_idx == 0)
    def _():
        h_scr[...] = jnp.zeros_like(h_scr)
        c_scr[...] = jnp.zeros_like(c_scr)

    whh = whh_ref[...]                         # (H, 4H) bf16, hoisted out of the loop
    H = HIDDEN

    # Load state from VMEM once per chunk; the recurrence carries it in vregs.
    h0 = h_scr[...]
    c0 = c_scr[...]

    def run(masked):
        def step(i, carry):
            h, hb, c = carry                   # h: f32, hb: bf16 copy, c: f32
            gates = gx_ref[i].astype(jnp.float32) + jnp.dot(
                hb, whh, preferred_element_type=jnp.float32)          # (B_blk, 4H) f32

            # sigmoid(x) = 0.5*tanh(0.5*x) + 0.5  -> single EUP op per gate
            i_g = 0.5 * jnp.tanh(0.5 * gates[:, 0:H]) + 0.5
            f_g = 0.5 * jnp.tanh(0.5 * gates[:, H:2 * H]) + 0.5
            g_g = jnp.tanh(gates[:, 2 * H:3 * H])
            c_new = f_g * c + i_g * g_g                               # before o_g (live range)
            o_g = 0.5 * jnp.tanh(0.5 * gates[:, 3 * H:4 * H]) + 0.5
            h_new = o_g * jnp.tanh(c_new)

            if masked:
                # arithmetic blend: ignore padded timesteps (final chunk only)
                m = ((c_idx * chunk + i) < seq_len).astype(jnp.float32)
                c_new = m * c_new + (1.0 - m) * c
                h_new = m * h_new + (1.0 - m) * h
            return h_new, h_new.astype(jnp.bfloat16), c_new

        h, _, c = lax.fori_loop(0, chunk, step,
                                (h0, h0.astype(jnp.bfloat16), c0),
                                unroll=unroll)
        h_scr[...] = h
        c_scr[...] = c

    if mask_tail:
        @pl.when(c_idx == last)
        def _():
            run(masked=True)

        @pl.when(c_idx != last)
        def _():
            run(masked=False)
    else:
        run(masked=False)

    @pl.when(c_idx == last)
    def _():
        h_out_ref[...] = h_scr[...]


@jax.jit
def lstm_forward(s_inp, flow_x, params):
    (wih_t, whh_t, b_all, w1_t, b1, a1, w2_t, b2, a2) = params

    B, T, f1 = s_inp.shape
    f2 = flow_x.shape[2]
    assert f1 + f2 == IN_FEAT

    kind = _device_kind()
    b_blk, chunk, unroll, vmem_limit = _plan(B, T, kind)
    nb = B // b_blk
    n_chunks = pl.cdiv(T, chunk)
    t_pad = n_chunks * chunk
    mask_tail = (t_pad != T)

    # Hoisted input projection for ALL timesteps, emitted time-major directly:
    # transpose the tiny (B,T,feat) inputs first so the big (T,B,4H) GEMM output needs
    # no layout change; the concat is folded in by splitting W_ih^T; result cast to bf16
    # (halves the dominant HBM stream and the kernel's gx VMEM blocks).
    s_tm = jnp.transpose(s_inp, (1, 0, 2))                            # (T, B, f1), tiny
    f_tm = jnp.transpose(flow_x, (1, 0, 2))                           # (T, B, f2), tiny
    gx = (jnp.einsum('tbf,fg->tbg', s_tm, wih_t[:f1],
                     preferred_element_type=jnp.float32)
          + jnp.einsum('tbf,fg->tbg', f_tm, wih_t[f1:],
                       preferred_element_type=jnp.float32)
          + b_all).astype(jnp.bfloat16)                               # (T, B, 4H) bf16
    if mask_tail:
        gx = jnp.pad(gx, ((0, t_pad - T), (0, 0), (0, 0)))

    whh_bf = whh_t.astype(jnp.bfloat16)        # pre-cast once; kernel keeps it resident

    kernel = functools.partial(_lstm_chunk_kernel, chunk=chunk, seq_len=T,
                               mask_tail=mask_tail, unroll=unroll)

    h_last = pl.pallas_call(
        kernel,
        out_shape=jax.ShapeDtypeStruct((B, HIDDEN), jnp.float32),
        grid_spec=pltpu.PrefetchScalarGridSpec(
            num_scalar_prefetch=0,
            grid=(nb, n_chunks),
            in_specs=[
                pl.BlockSpec((chunk, b_blk, GATES), lambda b, c: (c, b, 0)),  # gx (bf16)
                pl.BlockSpec((HIDDEN, GATES), lambda b, c: (0, 0)),           # W_hh^T (bf16)
            ],
            out_specs=pl.BlockSpec((b_blk, HIDDEN), lambda b, c: (b, 0)),
            scratch_shapes=[
                pltpu.VMEM((b_blk, HIDDEN), jnp.float32),    # h state
                pltpu.VMEM((b_blk, HIDDEN), jnp.float32),    # c state
            ],
        ),
        compiler_params=pltpu.CompilerParams(
            dimension_semantics=("parallel", "arbitrary"),   # batch || , time = recurrence
            vmem_limit_bytes=vmem_limit,
        ),
    )(gx, whh_bf)

    # Tiny FC head (runs once on the last hidden state) — left to XLA.
    prelu = lambda z, a: jnp.where(z >= 0.0, z, a * z)
    z1 = prelu(h_last @ w1_t + b1, a1[0, 0])
    z2 = prelu(z1 @ w2_t + b2, a2[0, 0])
    return z2


def init_params(key):
    k = 1.0 / jnp.sqrt(jnp.float32(HIDDEN))
    ks = jax.random.split(key, 8)
    u = lambda kk, shape, bound: jax.random.uniform(kk, shape, jnp.float32, -bound, bound)

    w_ih = u(ks[0], (4 * HIDDEN, IN_FEAT), k)       # PyTorch layout (4H, in)
    w_hh = u(ks[1], (4 * HIDDEN, HIDDEN), k)
    b_ih = u(ks[2], (4 * HIDDEN,), k)
    b_hh = u(ks[3], (4 * HIDDEN,), k)

    k1 = 1.0 / jnp.sqrt(jnp.float32(HIDDEN))
    w1 = u(ks[4], (FC_MID, HIDDEN), k1)
    b1 = u(ks[5], (FC_MID,), k1)
    k2 = 1.0 / jnp.sqrt(jnp.float32(FC_MID))
    w2 = u(ks[6], (1, FC_MID), k2)
    b2 = u(ks[7], (1,), k2)

    alpha1 = jnp.full((1, 1), 0.25, jnp.float32)    # PReLU default init
    alpha2 = jnp.full((1, 1), 0.25, jnp.float32)

    params = (
        w_ih.T,                                     # (6, 4H)
        w_hh.T,                                     # (H, 4H)
        (b_ih + b_hh).reshape(1, GATES),
        w1.T,                                       # (H, 64)
        b1.reshape(1, FC_MID),
        alpha1,
        w2.T,                                       # (64, 1)
        b2.reshape(1, 1),
        alpha2,
    )
    return params


def reference_forward(s_inp, flow_x, params):
    """Pure-JAX f32 reference mirroring PyTorch semantics."""
    (wih_t, whh_t, b_all, w1_t, b1, a1, w2_t, b2, a2) = params
    x = jnp.concatenate([s_inp, flow_x], axis=2)    # (B, T, 6)
    B = x.shape[0]
    H = HIDDEN

    def step(carry, x_t):
        h, c = carry
        g = x_t @ wih_t + h @ whh_t + b_all
        i = jax.nn.sigmoid(g[:, :H])
        f = jax.nn.sigmoid(g[:, H:2 * H])
        gg = jnp.tanh(g[:, 2 * H:3 * H])
        o = jax.nn.sigmoid(g[:, 3 * H:])
        c = f * c + i * gg
        h = o * jnp.tanh(c)
        return (h, c), None

    h0 = jnp.zeros((B, H), jnp.float32)
    c0 = jnp.zeros((B, H), jnp.float32)
    (h, _), _ = lax.scan(step, (h0, c0), jnp.transpose(x, (1, 0, 2)))

    prelu = lambda z, a: jnp.where(z >= 0.0, z, a * z)
    z1 = prelu(h @ w1_t + b1, a1[0, 0])
    z2 = prelu(z1 @ w2_t + b2, a2[0, 0])
    return z2


if __name__ == "__main__":
    key = jax.random.PRNGKey(0)
    kp, ks, kf = jax.random.split(key, 3)

    params = init_params(kp)

    def check(B, T, seed_a, seed_b):
        s = jax.random.normal(seed_a, (B, T, 3), jnp.float32)
        f = jax.random.normal(seed_b, (B, T, 3), jnp.float32)
        out = jax.block_until_ready(lstm_forward(s, f, params))
        assert out.shape == (B, 1), out.shape
        ref = reference_forward(s, f, params)
        assert jnp.allclose(out, ref, atol=5e-2, rtol=5e-2), (out, ref)

    # --- primary config (matches small module shapes): B=2, T=8, features 3+3=6 ---
    check(2, 8, ks, kf)

    # --- single-chunk, non-multiple-of-8 sequence length ---
    check(4, 20, jax.random.PRNGKey(1), jax.random.PRNGKey(2))

    # --- multi-chunk time grid + masked tail chunk on every TPU generation ---
    check(4, 72, jax.random.PRNGKey(3), jax.random.PRNGKey(4))

    print("KERNEL_OK")
</pallas_src>

<mosaic_0001>
module attributes {stable_mosaic.version = 11 : i64} {
  func.func @_lstm_chunk_kernel(%arg0: i32, %arg1: i32, %arg2: memref<8x2x512xbf16, #tpu.memory_space<vmem>>, %arg3: memref<128x512xbf16, #tpu.memory_space<vmem>>, %arg4: memref<2x128xf32, #tpu.memory_space<vmem>>, %arg5: memref<2x128xf32, #tpu.memory_space<vmem>>, %arg6: memref<2x128xf32, #tpu.memory_space<vmem>>) attributes {dimension_semantics = [#tpu.dimension_semantics<parallel>, #tpu.dimension_semantics<arbitrary>], iteration_bounds = array<i64: 1, 1>, scalar_prefetch = 0 : i64, scratch_operands = 2 : i64, tpu.core_type = #tpu.core_type<tc>, window_params = [{transform_indices = @transform_0, window_bounds = array<i64: 8, 2, 512>}, {pipeline_mode = #tpu.pipeline_mode<synchronous>, transform_indices = @transform_1, window_bounds = array<i64: 128, 512>}, {transform_indices = @transform_2, window_bounds = array<i64: 2, 128>}]} {
    %c0_i32 = arith.constant 0 : i32
    %0 = arith.cmpi eq, %arg1, %c0_i32 : i32
    %1 = arith.extui %0 : i1 to i32
    %c0_i32_0 = arith.constant 0 : i32
    %2 = arith.cmpi ne, %1, %c0_i32_0 : i32
    scf.if %2 {
      %cst_108 = arith.constant 0.000000e+00 : f32
      %316 = vector.broadcast %cst_108 : f32 to vector<2x128xf32>
      %c0_109 = arith.constant 0 : index
      %c0_110 = arith.constant 0 : index
      %317 = vector.load %arg5[%c0_109, %c0_110] : memref<2x128xf32, #tpu.memory_space<vmem>>, vector<2x128xf32>
      tpu.vector_store %arg5[%c0_109, %c0_110], %316 {strides = array<i32>} : memref<2x128xf32, #tpu.memory_space<vmem>>, vector<2x128xf32>,
      %cst_111 = arith.constant 0.000000e+00 : f32
      %318 = vector.broadcast %cst_111 : f32 to vector<2x128xf32>
      %c0_112 = arith.constant 0 : index
      %c0_113 = arith.constant 0 : index
      %319 = vector.load %arg6[%c0_112, %c0_113] : memref<2x128xf32, #tpu.memory_space<vmem>>, vector<2x128xf32>
      tpu.vector_store %arg6[%c0_112, %c0_113], %318 {strides = array<i32>} : memref<2x128xf32, #tpu.memory_space<vmem>>, vector<2x128xf32>,
    } else {
    }
    %c0 = arith.constant 0 : index
    %c0_1 = arith.constant 0 : index
    %3 = vector.load %arg3[%c0, %c0_1] : memref<128x512xbf16, #tpu.memory_space<vmem>>, vector<128x512xbf16>
    %c0_2 = arith.constant 0 : index
    %c0_3 = arith.constant 0 : index
    %4 = vector.load %arg5[%c0_2, %c0_3] : memref<2x128xf32, #tpu.memory_space<vmem>>, vector<2x128xf32>
    %c0_4 = arith.constant 0 : index
    %c0_5 = arith.constant 0 : index
    %5 = vector.load %arg6[%c0_4, %c0_5] : memref<2x128xf32, #tpu.memory_space<vmem>>, vector<2x128xf32>
    %6 = arith.truncf %4 : vector<2x128xf32> to vector<2x128xbf16>
    %c0_i32_6 = arith.constant 0 : i32
    %7 = arith.index_cast %c0_i32_6 : i32 to index
    %c0_7 = arith.constant 0 : index
    %c0_8 = arith.constant 0 : index
    %8 = vector.load %arg2[%7, %c0_7, %c0_8] : memref<8x2x512xbf16, #tpu.memory_space<vmem>>, vector<1x2x512xbf16>
    %9 = vector.shape_cast %8 : vector<1x2x512xbf16> to vector<2x512xbf16>
    %10 = arith.extf %9 : vector<2x512xbf16> to vector<2x512xf32>
    %cst = arith.constant dense<0.000000e+00> : vector<2x512xf32>
    %11 = tpu.matmul %6, %3, %cst {dimension_numbers = #tpu.dot_dimension_numbers<[1], [0], [0], [1], [0, 0, 1, 1], [], []>} : vector<2x128xbf16>, vector<128x512xbf16>, vector<2x512xf32> -> vector<2x512xf32>
    %12 = arith.addf %10, %11 : vector<2x512xf32>
    %13 = vector.extract_strided_slice %12 {offsets = [0, 0], sizes = [2, 128], strides = [1, 1]} : vector<2x512xf32> to vector<2x128xf32>
    %cst_9 = arith.constant 5.000000e-01 : f32
    %14 = vector.broadcast %cst_9 : f32 to vector<2x128xf32>
    %15 = arith.mulf %14, %13 : vector<2x128xf32>
    %16 = math.tanh %15 : vector<2x128xf32>
    %cst_10 = arith.constant 5.000000e-01 : f32
    %17 = vector.broadcast %cst_10 : f32 to vector<2x128xf32>
    %18 = arith.mulf %17, %16 : vector<2x128xf32>
    %cst_11 = arith.constant 5.000000e-01 : f32
    %19 = vector.broadcast %cst_11 : f32 to vector<2x128xf32>
    %20 = arith.addf %18, %19 : vector<2x128xf32>
    %21 = vector.extract_strided_slice %12 {offsets = [0, 128], sizes = [2, 128], strides = [1, 1]} : vector<2x512xf32> to vector<2x128xf32>
    %cst_12 = arith.constant 5.000000e-01 : f32
    %22 = vector.broadcast %cst_12 : f32 to vector<2x128xf32>
    %23 = arith.mulf %22, %21 : vector<2x128xf32>
    %24 = math.tanh %23 : vector<2x128xf32>
    %cst_13 = arith.constant 5.000000e-01 : f32
    %25 = vector.broadcast %cst_13 : f32 to vector<2x128xf32>
    %26 = arith.mulf %25, %24 : vector<2x128xf32>
    %cst_14 = arith.constant 5.000000e-01 : f32
    %27 = vector.broadcast %cst_14 : f32 to vector<2x128xf32>
    %28 = arith.addf %26, %27 : vector<2x128xf32>
    %29 = vector.extract_strided_slice %12 {offsets = [0, 256], sizes = [2, 128], strides = [1, 1]} : vector<2x512xf32> to vector<2x128xf32>
    %30 = math.tanh %29 : vector<2x128xf32>
    %31 = arith.mulf %28, %5 : vector<2x128xf32>
    %32 = arith.mulf %20, %30 : vector<2x128xf32>
    %33 = arith.addf %31, %32 : vector<2x128xf32>
    %34 = vector.extract_strided_slice %12 {offsets = [0, 384], sizes = [2, 128], strides = [1, 1]} : vector<2x512xf32> to vector<2x128xf32>
    %cst_15 = arith.constant 5.000000e-01 : f32
    %35 = vector.broadcast %cst_15 : f32 to vector<2x128xf32>
    %36 = arith.mulf %35, %34 : vector<2x128xf32>
    %37 = math.tanh %36 : vector<2x128xf32>
    %cst_16 = arith.constant 5.000000e-01 : f32
    %38 = vector.broadcast %cst_16 : f32 to vector<2x128xf32>
    %39 = arith.mulf %38, %37 : vector<2x128xf32>
    %cst_17 = arith.constant 5.000000e-01 : f32
    %40 = vector.broadcast %cst_17 : f32 to vector<2x128xf32>
    %41 = arith.addf %39, %40 : vector<2x128xf32>
    %42 = math.tanh %33 : vector<2x128xf32>
    %43 = arith.mulf %41, %42 : vector<2x128xf32>
    %44 = arith.truncf %43 : vector<2x128xf32> to vector<2x128xbf16>
    %c1_i32 = arith.constant 1 : i32
    %45 = arith.index_cast %c1_i32 : i32 to index
    %c0_18 = arith.constant 0 : index
    %c0_19 = arith.constant 0 : index
    %46 = vector.load %arg2[%45, %c0_18, %c0_19] : memref<8x2x512xbf16, #tpu.memory_space<vmem>>, vector<1x2x512xbf16>
    %47 = vector.shape_cast %46 : vector<1x2x512xbf16> to vector<2x512xbf16>
    %48 = arith.extf %47 : vector<2x512xbf16> to vector<2x512xf32>
    %cst_20 = arith.constant dense<0.000000e+00> : vector<2x512xf32>
    %49 = tpu.matmul %44, %3, %cst_20 {dimension_numbers = #tpu.dot_dimension_numbers<[1], [0], [0], [1], [0, 0, 1, 1], [], []>} : vector<2x128xbf16>, vector<128x512xbf16>, vector<2x512xf32> -> vector<2x512xf32>
    %50 = arith.addf %48, %49 : vector<2x512xf32>
    %51 = vector.extract_strided_slice %50 {offsets = [0, 0], sizes = [2, 128], strides = [1, 1]} : vector<2x512xf32> to vector<2x128xf32>
    %cst_21 = arith.constant 5.000000e-01 : f32
    %52 = vector.broadcast %cst_21 : f32 to vector<2x128xf32>
    %53 = arith.mulf %52, %51 : vector<2x128xf32>
    %54 = math.tanh %53 : vector<2x128xf32>
    %cst_22 = arith.constant 5.000000e-01 : f32
    %55 = vector.broadcast %cst_22 : f32 to vector<2x128xf32>
    %56 = arith.mulf %55, %54 : vector<2x128xf32>
    %cst_23 = arith.constant 5.000000e-01 : f32
    %57 = vector.broadcast %cst_23 : f32 to vector<2x128xf32>
    %58 = arith.addf %56, %57 : vector<2x128xf32>
    %59 = vector.extract_strided_slice %50 {offsets = [0, 128], sizes = [2, 128], strides = [1, 1]} : vector<2x512xf32> to vector<2x128xf32>
    %cst_24 = arith.constant 5.000000e-01 : f32
    %60 = vector.broadcast %cst_24 : f32 to vector<2x128xf32>
    %61 = arith.mulf %60, %59 : vector<2x128xf32>
    %62 = math.tanh %61 : vector<2x128xf32>
    %cst_25 = arith.constant 5.000000e-01 : f32
    %63 = vector.broadcast %cst_25 : f32 to vector<2x128xf32>
    %64 = arith.mulf %63, %62 : vector<2x128xf32>
    %cst_26 = arith.constant 5.000000e-01 : f32
    %65 = vector.broadcast %cst_26 : f32 to vector<2x128xf32>
    %66 = arith.addf %64, %65 : vector<2x128xf32>
    %67 = vector.extract_strided_slice %50 {offsets = [0, 256], sizes = [2, 128], strides = [1, 1]} : vector<2x512xf32> to vector<2x128xf32>
    %68 = math.tanh %67 : vector<2x128xf32>
    %69 = arith.mulf %66, %33 : vector<2x128xf32>
    %70 = arith.mulf %58, %68 : vector<2x128xf32>
    %71 = arith.addf %69, %70 : vector<2x128xf32>
    %72 = vector.extract_strided_slice %50 {offsets = [0, 384], sizes = [2, 128], strides = [1, 1]} : vector<2x512xf32> to vector<2x128xf32>
    %cst_27 = arith.constant 5.000000e-01 : f32
    %73 = vector.broadcast %cst_27 : f32 to vector<2x128xf32>
    %74 = arith.mulf %73, %72 : vector<2x128xf32>
    %75 = math.tanh %74 : vector<2x128xf32>
    %cst_28 = arith.constant 5.000000e-01 : f32
    %76 = vector.broadcast %cst_28 : f32 to vector<2x128xf32>
    %77 = arith.mulf %76, %75 : vector<2x128xf32>
    %cst_29 = arith.constant 5.000000e-01 : f32
    %78 = vector.broadcast %cst_29 : f32 to vector<2x128xf32>
    %79 = arith.addf %77, %78 : vector<2x128xf32>
    %80 = math.tanh %71 : vector<2x128xf32>
    %81 = arith.mulf %79, %80 : vector<2x128xf32>
    %82 = arith.truncf %81 : vector<2x128xf32> to vector<2x128xbf16>
    %c2_i32 = arith.constant 2 : i32
    %83 = arith.index_cast %c2_i32 : i32 to index
    %c0_30 = arith.constant 0 : index
    %c0_31 = arith.constant 0 : index
    %84 = vector.load %arg2[%83, %c0_30, %c0_31] : memref<8x2x512xbf16, #tpu.memory_space<vmem>>, vector<1x2x512xbf16>
    %85 = vector.shape_cast %84 : vector<1x2x512xbf16> to vector<2x512xbf16>
    %86 = arith.extf %85 : vector<2x512xbf16> to vector<2x512xf32>
    %cst_32 = arith.constant dense<0.000000e+00> : vector<2x512xf32>
    %87 = tpu.matmul %82, %3, %cst_32 {dimension_numbers = #tpu.dot_dimension_numbers<[1], [0], [0], [1], [0, 0, 1, 1], [], []>} : vector<2x128xbf16>, vector<128x512xbf16>, vector<2x512xf32> -> vector<2x512xf32>
    %88 = arith.addf %86, %87 : vector<2x512xf32>
    %89 = vector.extract_strided_slice %88 {offsets = [0, 0], sizes = [2, 128], strides = [1, 1]} : vector<2x512xf32> to vector<2x128xf32>
    %cst_33 = arith.constant 5.000000e-01 : f32
    %90 = vector.broadcast %cst_33 : f32 to vector<2x128xf32>
    %91 = arith.mulf %90, %89 : vector<2x128xf32>
    %92 = math.tanh %91 : vector<2x128xf32>
    %cst_34 = arith.constant 5.000000e-01 : f32
    %93 = vector.broadcast %cst_34 : f32 to vector<2x128xf32>
    %94 = arith.mulf %93, %92 : vector<2x128xf32>
    %cst_35 = arith.constant 5.000000e-01 : f32
    %95 = vector.broadcast %cst_35 : f32 to vector<2x128xf32>
    %96 = arith.addf %94, %95 : vector<2x128xf32>
    %97 = vector.extract_strided_slice %88 {offsets = [0, 128], sizes = [2, 128], strides = [1, 1]} : vector<2x512xf32> to vector<2x128xf32>
    %cst_36 = arith.constant 5.000000e-01 : f32
    %98 = vector.broadcast %cst_36 : f32 to vector<2x128xf32>
    %99 = arith.mulf %98, %97 : vector<2x128xf32>
    %100 = math.tanh %99 : vector<2x128xf32>
    %cst_37 = arith.constant 5.000000e-01 : f32
    %101 = vector.broadcast %cst_37 : f32 to vector<2x128xf32>
    %102 = arith.mulf %101, %100 : vector<2x128xf32>
    %cst_38 = arith.constant 5.000000e-01 : f32
    %103 = vector.broadcast %cst_38 : f32 to vector<2x128xf32>
    %104 = arith.addf %102, %103 : vector<2x128xf32>
    %105 = vector.extract_strided_slice %88 {offsets = [0, 256], sizes = [2, 128], strides = [1, 1]} : vector<2x512xf32> to vector<2x128xf32>
    %106 = math.tanh %105 : vector<2x128xf32>
    %107 = arith.mulf %104, %71 : vector<2x128xf32>
    %108 = arith.mulf %96, %106 : vector<2x128xf32>
    %109 = arith.addf %107, %108 : vector<2x128xf32>
    %110 = vector.extract_strided_slice %88 {offsets = [0, 384], sizes = [2, 128], strides = [1, 1]} : vector<2x512xf32> to vector<2x128xf32>
    %cst_39 = arith.constant 5.000000e-01 : f32
    %111 = vector.broadcast %cst_39 : f32 to vector<2x128xf32>
    %112 = arith.mulf %111, %110 : vector<2x128xf32>
    %113 = math.tanh %112 : vector<2x128xf32>
    %cst_40 = arith.constant 5.000000e-01 : f32
    %114 = vector.broadcast %cst_40 : f32 to vector<2x128xf32>
    %115 = arith.mulf %114, %113 : vector<2x128xf32>
    %cst_41 = arith.constant 5.000000e-01 : f32
    %116 = vector.broadcast %cst_41 : f32 to vector<2x128xf32>
    %117 = arith.addf %115, %116 : vector<2x128xf32>
    %118 = math.tanh %109 : vector<2x128xf32>
    %119 = arith.mulf %117, %118 : vector<2x128xf32>
    %120 = arith.truncf %119 : vector<2x128xf32> to vector<2x128xbf16>
    %c3_i32 = arith.constant 3 : i32
    %121 = arith.index_cast %c3_i32 : i32 to index
    %c0_42 = arith.constant 0 : index
    %c0_43 = arith.constant 0 : index
    %122 = vector.load %arg2[%121, %c0_42, %c0_43] : memref<8x2x512xbf16, #tpu.memory_space<vmem>>, vector<1x2x512xbf16>
    %123 = vector.shape_cast %122 : vector<1x2x512xbf16> to vector<2x512xbf16>
    %124 = arith.extf %123 : vector<2x512xbf16> to vector<2x512xf32>
    %cst_44 = arith.constant dense<0.000000e+00> : vector<2x512xf32>
    %125 = tpu.matmul %120, %3, %cst_44 {dimension_numbers = #tpu.dot_dimension_numbers<[1], [0], [0], [1], [0, 0, 1, 1], [], []>} : vector<2x128xbf16>, vector<128x512xbf16>, vector<2x512xf32> -> vector<2x512xf32>
    %126 = arith.addf %124, %125 : vector<2x512xf32>
    %127 = vector.extract_strided_slice %126 {offsets = [0, 0], sizes = [2, 128], strides = [1, 1]} : vector<2x512xf32> to vector<2x128xf32>
    %cst_45 = arith.constant 5.000000e-01 : f32
    %128 = vector.broadcast %cst_45 : f32 to vector<2x128xf32>
    %129 = arith.mulf %128, %127 : vector<2x128xf32>
    %130 = math.tanh %129 : vector<2x128xf32>
    %cst_46 = arith.constant 5.000000e-01 : f32
    %131 = vector.broadcast %cst_46 : f32 to vector<2x128xf32>
    %132 = arith.mulf %131, %130 : vector<2x128xf32>
    %cst_47 = arith.constant 5.000000e-01 : f32
    %133 = vector.broadcast %cst_47 : f32 to vector<2x128xf32>
    %134 = arith.addf %132, %133 : vector<2x128xf32>
    %135 = vector.extract_strided_slice %126 {offsets = [0, 128], sizes = [2, 128], strides = [1, 1]} : vector<2x512xf32> to vector<2x128xf32>
    %cst_48 = arith.constant 5.000000e-01 : f32
    %136 = vector.broadcast %cst_48 : f32 to vector<2x128xf32>
    %137 = arith.mulf %136, %135 : vector<2x128xf32>
    %138 = math.tanh %137 : vector<2x128xf32>
    %cst_49 = arith.constant 5.000000e-01 : f32
    %139 = vector.broadcast %cst_49 : f32 to vector<2x128xf32>
    %140 = arith.mulf %139, %138 : vector<2x128xf32>
    %cst_50 = arith.constant 5.000000e-01 : f32
    %141 = vector.broadcast %cst_50 : f32 to vector<2x128xf32>
    %142 = arith.addf %140, %141 : vector<2x128xf32>
    %143 = vector.extract_strided_slice %126 {offsets = [0, 256], sizes = [2, 128], strides = [1, 1]} : vector<2x512xf32> to vector<2x128xf32>
    %144 = math.tanh %143 : vector<2x128xf32>
    %145 = arith.mulf %142, %109 : vector<2x128xf32>
    %146 = arith.mulf %134, %144 : vector<2x128xf32>
    %147 = arith.addf %145, %146 : vector<2x128xf32>
    %148 = vector.extract_strided_slice %126 {offsets = [0, 384], sizes = [2, 128], strides = [1, 1]} : vector<2x512xf32> to vector<2x128xf32>
    %cst_51 = arith.constant 5.000000e-01 : f32
    %149 = vector.broadcast %cst_51 : f32 to vector<2x128xf32>
    %150 = arith.mulf %149, %148 : vector<2x128xf32>
    %151 = math.tanh %150 : vector<2x128xf32>
    %cst_52 = arith.constant 5.000000e-01 : f32
    %152 = vector.broadcast %cst_52 : f32 to vector<2x128xf32>
    %153 = arith.mulf %152, %151 : vector<2x128xf32>
    %cst_53 = arith.constant 5.000000e-01 : f32
    %154 = vector.broadcast %cst_53 : f32 to vector<2x128xf32>
    %155 = arith.addf %153, %154 : vector<2x128xf32>
    %156 = math.tanh %147 : vector<2x128xf32>
    %157 = arith.mulf %155, %156 : vector<2x128xf32>
    %158 = arith.truncf %157 : vector<2x128xf32> to vector<2x128xbf16>
    %c4_i32 = arith.constant 4 : i32
    %159 = arith.index_cast %c4_i32 : i32 to index
    %c0_54 = arith.constant 0 : index
    %c0_55 = arith.constant 0 : index
    %160 = vector.load %arg2[%159, %c0_54, %c0_55] : memref<8x2x512xbf16, #tpu.memory_space<vmem>>, vector<1x2x512xbf16>
    %161 = vector.shape_cast %160 : vector<1x2x512xbf16> to vector<2x512xbf16>
    %162 = arith.extf %161 : vector<2x512xbf16> to vector<2x512xf32>
    %cst_56 = arith.constant dense<0.000000e+00> : vector<2x512xf32>
    %163 = tpu.matmul %158, %3, %cst_56 {dimension_numbers = #tpu.dot_dimension_numbers<[1], [0], [0], [1], [0, 0, 1, 1], [], []>} : vector<2x128xbf16>, vector<128x512xbf16>, vector<2x512xf32> -> vector<2x512xf32>
    %164 = arith.addf %162, %163 : vector<2x512xf32>
    %165 = vector.extract_strided_slice %164 {offsets = [0, 0], sizes = [2, 128], strides = [1, 1]} : vector<2x512xf32> to vector<2x128xf32>
    %cst_57 = arith.constant 5.000000e-01 : f32
    %166 = vector.broadcast %cst_57 : f32 to vector<2x128xf32>
    %167 = arith.mulf %166, %165 : vector<2x128xf32>
    %168 = math.tanh %167 : vector<2x128xf32>
    %cst_58 = arith.constant 5.000000e-01 : f32
    %169 = vector.broadcast %cst_58 : f32 to vector<2x128xf32>
    %170 = arith.mulf %169, %168 : vector<2x128xf32>
    %cst_59 = arith.constant 5.000000e-01 : f32
    %171 = vector.broadcast %cst_59 : f32 to vector<2x128xf32>
    %172 = arith.addf %170, %171 : vector<2x128xf32>
    %173 = vector.extract_strided_slice %164 {offsets = [0, 128], sizes = [2, 128], strides = [1, 1]} : vector<2x512xf32> to vector<2x128xf32>
    %cst_60 = arith.constant 5.000000e-01 : f32
    %174 = vector.broadcast %cst_60 : f32 to vector<2x128xf32>
    %175 = arith.mulf %174, %173 : vector<2x128xf32>
    %176 = math.tanh %175 : vector<2x128xf32>
    %cst_61 = arith.constant 5.000000e-01 : f32
    %177 = vector.broadcast %cst_61 : f32 to vector<2x128xf32>
    %178 = arith.mulf %177, %176 : vector<2x128xf32>
    %cst_62 = arith.constant 5.000000e-01 : f32
    %179 = vector.broadcast %cst_62 : f32 to vector<2x128xf32>
    %180 = arith.addf %178, %179 : vector<2x128xf32>
    %181 = vector.extract_strided_slice %164 {offsets = [0, 256], sizes = [2, 128], strides = [1, 1]} : vector<2x512xf32> to vector<2x128xf32>
    %182 = math.tanh %181 : vector<2x128xf32>
    %183 = arith.mulf %180, %147 : vector<2x128xf32>
    %184 = arith.mulf %172, %182 : vector<2x128xf32>
    %185 = arith.addf %183, %184 : vector<2x128xf32>
    %186 = vector.extract_strided_slice %164 {offsets = [0, 384], sizes = [2, 128], strides = [1, 1]} : vector<2x512xf32> to vector<2x128xf32>
    %cst_63 = arith.constant 5.000000e-01 : f32
    %187 = vector.broadcast %cst_63 : f32 to vector<2x128xf32>
    %188 = arith.mulf %187, %186 : vector<2x128xf32>
    %189 = math.tanh %188 : vector<2x128xf32>
    %cst_64 = arith.constant 5.000000e-01 : f32
    %190 = vector.broadcast %cst_64 : f32 to vector<2x128xf32>
    %191 = arith.mulf %190, %189 : vector<2x128xf32>
    %cst_65 = arith.constant 5.000000e-01 : f32
    %192 = vector.broadcast %cst_65 : f32 to vector<2x128xf32>
    %193 = arith.addf %191, %192 : vector<2x128xf32>
    %194 = math.tanh %185 : vector<2x128xf32>
    %195 = arith.mulf %193, %194 : vector<2x128xf32>
    %196 = arith.truncf %195 : vector<2x128xf32> to vector<2x128xbf16>
    %c5_i32 = arith.constant 5 : i32
    %197 = arith.index_cast %c5_i32 : i32 to index
    %c0_66 = arith.constant 0 : index
    %c0_67 = arith.constant 0 : index
    %198 = vector.load %arg2[%197, %c0_66, %c0_67] : memref<8x2x512xbf16, #tpu.memory_space<vmem>>, vector<1x2x512xbf16>
    %199 = vector.shape_cast %198 : vector<1x2x512xbf16> to vector<2x512xbf16>
    %200 = arith.extf %199 : vector<2x512xbf16> to vector<2x512xf32>
    %cst_68 = arith.constant dense<0.000000e+00> : vector<2x512xf32>
    %201 = tpu.matmul %196, %3, %cst_68 {dimension_numbers = #tpu.dot_dimension_numbers<[1], [0], [0], [1], [0, 0, 1, 1], [], []>} : vector<2x128xbf16>, vector<128x512xbf16>, vector<2x512xf32> -> vector<2x512xf32>
    %202 = arith.addf %200, %201 : vector<2x512xf32>
    %203 = vector.extract_strided_slice %202 {offsets = [0, 0], sizes = [2, 128], strides = [1, 1]} : vector<2x512xf32> to vector<2x128xf32>
    %cst_69 = arith.constant 5.000000e-01 : f32
    %204 = vector.broadcast %cst_69 : f32 to vector<2x128xf32>
    %205 = arith.mulf %204, %203 : vector<2x128xf32>
    %206 = math.tanh %205 : vector<2x128xf32>
    %cst_70 = arith.constant 5.000000e-01 : f32
    %207 = vector.broadcast %cst_70 : f32 to vector<2x128xf32>
    %208 = arith.mulf %207, %206 : vector<2x128xf32>
    %cst_71 = arith.constant 5.000000e-01 : f32
    %209 = vector.broadcast %cst_71 : f32 to vector<2x128xf32>
    %210 = arith.addf %208, %209 : vector<2x128xf32>
    %211 = vector.extract_strided_slice %202 {offsets = [0, 128], sizes = [2, 128], strides = [1, 1]} : vector<2x512xf32> to vector<2x128xf32>
    %cst_72 = arith.constant 5.000000e-01 : f32
    %212 = vector.broadcast %cst_72 : f32 to vector<2x128xf32>
    %213 = arith.mulf %212, %211 : vector<2x128xf32>
    %214 = math.tanh %213 : vector<2x128xf32>
    %cst_73 = arith.constant 5.000000e-01 : f32
    %215 = vector.broadcast %cst_73 : f32 to vector<2x128xf32>
    %216 = arith.mulf %215, %214 : vector<2x128xf32>
    %cst_74 = arith.constant 5.000000e-01 : f32
    %217 = vector.broadcast %cst_74 : f32 to vector<2x128xf32>
    %218 = arith.addf %216, %217 : vector<2x128xf32>
    %219 = vector.extract_strided_slice %202 {offsets = [0, 256], sizes = [2, 128], strides = [1, 1]} : vector<2x512xf32> to vector<2x128xf32>
    %220 = math.tanh %219 : vector<2x128xf32>
    %221 = arith.mulf %218, %185 : vector<2x128xf32>
    %222 = arith.mulf %210, %220 : vector<2x128xf32>
    %223 = arith.addf %221, %222 : vector<2x128xf32>
    %224 = vector.extract_strided_slice %202 {offsets = [0, 384], sizes = [2, 128], strides = [1, 1]} : vector<2x512xf32> to vector<2x128xf32>
    %cst_75 = arith.constant 5.000000e-01 : f32
    %225 = vector.broadcast %cst_75 : f32 to vector<2x128xf32>
    %226 = arith.mulf %225, %224 : vector<2x128xf32>
    %227 = math.tanh %226 : vector<2x128xf32>
    %cst_76 = arith.constant 5.000000e-01 : f32
    %228 = vector.broadcast %cst_76 : f32 to vector<2x128xf32>
    %229 = arith.mulf %228, %227 : vector<2x128xf32>
    %cst_77 = arith.constant 5.000000e-01 : f32
    %230 = vector.broadcast %cst_77 : f32 to vector<2x128xf32>
    %231 = arith.addf %229, %230 : vector<2x128xf32>
    %232 = math.tanh %223 : vector<2x128xf32>
    %233 = arith.mulf %231, %232 : vector<2x128xf32>
    %234 = arith.truncf %233 : vector<2x128xf32> to vector<2x128xbf16>
    %c6_i32 = arith.constant 6 : i32
    %235 = arith.index_cast %c6_i32 : i32 to index
    %c0_78 = arith.constant 0 : index
    %c0_79 = arith.constant 0 : index
    %236 = vector.load %arg2[%235, %c0_78, %c0_79] : memref<8x2x512xbf16, #tpu.memory_space<vmem>>, vector<1x2x512xbf16>
    %237 = vector.shape_cast %236 : vector<1x2x512xbf16> to vector<2x512xbf16>
    %238 = arith.extf %237 : vector<2x512xbf16> to vector<2x512xf32>
    %cst_80 = arith.constant dense<0.000000e+00> : vector<2x512xf32>
    %239 = tpu.matmul %234, %3, %cst_80 {dimension_numbers = #tpu.dot_dimension_numbers<[1], [0], [0], [1], [0, 0, 1, 1], [], []>} : vector<2x128xbf16>, vector<128x512xbf16>, vector<2x512xf32> -> vector<2x512xf32>
    %240 = arith.addf %238, %239 : vector<2x512xf32>
    %241 = vector.extract_strided_slice %240 {offsets = [0, 0], sizes = [2, 128], strides = [1, 1]} : vector<2x512xf32> to vector<2x128xf32>
    %cst_81 = arith.constant 5.000000e-01 : f32
    %242 = vector.broadcast %cst_81 : f32 to vector<2x128xf32>
    %243 = arith.mulf %242, %241 : vector<2x128xf32>
    %244 = math.tanh %243 : vector<2x128xf32>
    %cst_82 = arith.constant 5.000000e-01 : f32
    %245 = vector.broadcast %cst_82 : f32 to vector<2x128xf32>
    %246 = arith.mulf %245, %244 : vector<2x128xf32>
    %cst_83 = arith.constant 5.000000e-01 : f32
    %247 = vector.broadcast %cst_83 : f32 to vector<2x128xf32>
    %248 = arith.addf %246, %247 : vector<2x128xf32>
    %249 = vector.extract_strided_slice %240 {offsets = [0, 128], sizes = [2, 128], strides = [1, 1]} : vector<2x512xf32> to vector<2x128xf32>
    %cst_84 = arith.constant 5.000000e-01 : f32
    %250 = vector.broadcast %cst_84 : f32 to vector<2x128xf32>
    %251 = arith.mulf %250, %249 : vector<2x128xf32>
    %252 = math.tanh %251 : vector<2x128xf32>
    %cst_85 = arith.constant 5.000000e-01 : f32
    %253 = vector.broadcast %cst_85 : f32 to vector<2x128xf32>
    %254 = arith.mulf %253, %252 : vector<2x128xf32>
    %cst_86 = arith.constant 5.000000e-01 : f32
    %255 = vector.broadcast %cst_86 : f32 to vector<2x128xf32>
    %256 = arith.addf %254, %255 : vector<2x128xf32>
    %257 = vector.extract_strided_slice %240 {offsets = [0, 256], sizes = [2, 128], strides = [1, 1]} : vector<2x512xf32> to vector<2x128xf32>
    %258 = math.tanh %257 : vector<2x128xf32>
    %259 = arith.mulf %256, %223 : vector<2x128xf32>
    %260 = arith.mulf %248, %258 : vector<2x128xf32>
    %261 = arith.addf %259, %260 : vector<2x128xf32>
    %262 = vector.extract_strided_slice %240 {offsets = [0, 384], sizes = [2, 128], strides = [1, 1]} : vector<2x512xf32> to vector<2x128xf32>
    %cst_87 = arith.constant 5.000000e-01 : f32
    %263 = vector.broadcast %cst_87 : f32 to vector<2x128xf32>
    %264 = arith.mulf %263, %262 : vector<2x128xf32>
    %265 = math.tanh %264 : vector<2x128xf32>
    %cst_88 = arith.constant 5.000000e-01 : f32
    %266 = vector.broadcast %cst_88 : f32 to vector<2x128xf32>
    %267 = arith.mulf %266, %265 : vector<2x128xf32>
    %cst_89 = arith.constant 5.000000e-01 : f32
    %268 = vector.broadcast %cst_89 : f32 to vector<2x128xf32>
    %269 = arith.addf %267, %268 : vector<2x128xf32>
    %270 = math.tanh %261 : vector<2x128xf32>
    %271 = arith.mulf %269, %270 : vector<2x128xf32>
    %272 = arith.truncf %271 : vector<2x128xf32> to vector<2x128xbf16>
    %c7_i32 = arith.constant 7 : i32
    %273 = arith.index_cast %c7_i32 : i32 to index
    %c0_90 = arith.constant 0 : index
    %c0_91 = arith.constant 0 : index
    %274 = vector.load %arg2[%273, %c0_90, %c0_91] : memref<8x2x512xbf16, #tpu.memory_space<vmem>>, vector<1x2x512xbf16>
    %275 = vector.shape_cast %274 : vector<1x2x512xbf16> to vector<2x512xbf16>
    %276 = arith.extf %275 : vector<2x512xbf16> to vector<2x512xf32>
    %cst_92 = arith.constant dense<0.000000e+00> : vector<2x512xf32>
    %277 = tpu.matmul %272, %3, %cst_92 {dimension_numbers = #tpu.dot_dimension_numbers<[1], [0], [0], [1], [0, 0, 1, 1], [], []>} : vector<2x128xbf16>, vector<128x512xbf16>, vector<2x512xf32> -> vector<2x512xf32>
    %278 = arith.addf %276, %277 : vector<2x512xf32>
    %279 = vector.extract_strided_slice %278 {offsets = [0, 0], sizes = [2, 128], strides = [1, 1]} : vector<2x512xf32> to vector<2x128xf32>
    %cst_93 = arith.constant 5.000000e-01 : f32
    %280 = vector.broadcast %cst_93 : f32 to vector<2x128xf32>
    %281 = arith.mulf %280, %279 : vector<2x128xf32>
    %282 = math.tanh %281 : vector<2x128xf32>
    %cst_94 = arith.constant 5.000000e-01 : f32
    %283 = vector.broadcast %cst_94 : f32 to vector<2x128xf32>
    %284 = arith.mulf %283, %282 : vector<2x128xf32>
    %cst_95 = arith.constant 5.000000e-01 : f32
    %285 = vector.broadcast %cst_95 : f32 to vector<2x128xf32>
    %286 = arith.addf %284, %285 : vector<2x128xf32>
    %287 = vector.extract_strided_slice %278 {offsets = [0, 128], sizes = [2, 128], strides = [1, 1]} : vector<2x512xf32> to vector<2x128xf32>
    %cst_96 = arith.constant 5.000000e-01 : f32
    %288 = vector.broadcast %cst_96 : f32 to vector<2x128xf32>
    %289 = arith.mulf %288, %287 : vector<2x128xf32>
    %290 = math.tanh %289 : vector<2x128xf32>
    %cst_97 = arith.constant 5.000000e-01 : f32
    %291 = vector.broadcast %cst_97 : f32 to vector<2x128xf32>
    %292 = arith.mulf %291, %290 : vector<2x128xf32>
    %cst_98 = arith.constant 5.000000e-01 : f32
    %293 = vector.broadcast %cst_98 : f32 to vector<2x128xf32>
    %294 = arith.addf %292, %293 : vector<2x128xf32>
    %295 = vector.extract_strided_slice %278 {offsets = [0, 256], sizes = [2, 128], strides = [1, 1]} : vector<2x512xf32> to vector<2x128xf32>
    %296 = math.tanh %295 : vector<2x128xf32>
    %297 = arith.mulf %294, %261 : vector<2x128xf32>
    %298 = arith.mulf %286, %296 : vector<2x128xf32>
    %299 = arith.addf %297, %298 : vector<2x128xf32>
    %300 = vector.extract_strided_slice %278 {offsets = [0, 384], sizes = [2, 128], strides = [1, 1]} : vector<2x512xf32> to vector<2x128xf32>
    %cst_99 = arith.constant 5.000000e-01 : f32
    %301 = vector.broadcast %cst_99 : f32 to vector<2x128xf32>
    %302 = arith.mulf %301, %300 : vector<2x128xf32>
    %303 = math.tanh %302 : vector<2x128xf32>
    %cst_100 = arith.constant 5.000000e-01 : f32
    %304 = vector.broadcast %cst_100 : f32 to vector<2x128xf32>
    %305 = arith.mulf %304, %303 : vector<2x128xf32>
    %cst_101 = arith.constant 5.000000e-01 : f32
    %306 = vector.broadcast %cst_101 : f32 to vector<2x128xf32>
    %307 = arith.addf %305, %306 : vector<2x128xf32>
    %308 = math.tanh %299 : vector<2x128xf32>
    %309 = arith.mulf %307, %308 : vector<2x128xf32>
    %310 = arith.truncf %309 : vector<2x128xf32> to vector<2x128xbf16>
    %c8_i32 = arith.constant 8 : i32
    %c0_102 = arith.constant 0 : index
    %c0_103 = arith.constant 0 : index
    %311 = vector.load %arg5[%c0_102, %c0_103] : memref<2x128xf32, #tpu.memory_space<vmem>>, vector<2x128xf32>
    tpu.vector_store %arg5[%c0_102, %c0_103], %309 {strides = array<i32>} : memref<2x128xf32, #tpu.memory_space<vmem>>, vector<2x128xf32>,
    %c0_104 = arith.constant 0 : index
    %c0_105 = arith.constant 0 : index
    %312 = vector.load %arg6[%c0_104, %c0_105] : memref<2x128xf32, #tpu.memory_space<vmem>>, vector<2x128xf32>
    tpu.vector_store %arg6[%c0_104, %c0_105], %299 {strides = array<i32>} : memref<2x128xf32, #tpu.memory_space<vmem>>, vector<2x128xf32>,
    %c0_i32_106 = arith.constant 0 : i32
    %313 = arith.cmpi eq, %arg1, %c0_i32_106 : i32
    %314 = arith.extui %313 : i1 to i32
    %c0_i32_107 = arith.constant 0 : i32
    %315 = arith.cmpi ne, %314, %c0_i32_107 : i32
    scf.if %315 {
      %c0_108 = arith.constant 0 : index
      %c0_109 = arith.constant 0 : index
      %316 = vector.load %arg5[%c0_108, %c0_109] : memref<2x128xf32, #tpu.memory_space<vmem>>, vector<2x128xf32>
      %c0_110 = arith.constant 0 : index
      %c0_111 = arith.constant 0 : index
      %317 = vector.load %arg4[%c0_110, %c0_111] : memref<2x128xf32, #tpu.memory_space<vmem>>, vector<2x128xf32>
      tpu.vector_store %arg4[%c0_110, %c0_111], %316 {strides = array<i32>} : memref<2x128xf32, #tpu.memory_space<vmem>>, vector<2x128xf32>,
    } else {
    }
    return
  }
  func.func @transform_0(%arg0: i32, %arg1: i32) -> (i32, i32, i32) {
    %c0_i32 = arith.constant 0 : i32
    %c0_i32_0 = arith.constant 0 : i32
    return %arg1, %arg0, %c0_i32 : i32, i32, i32
  }
  func.func @transform_1(%arg0: i32, %arg1: i32) -> (i32, i32) {
    %c0_i32 = arith.constant 0 : i32
    %c0_i32_0 = arith.constant 0 : i32
    %c0_i32_1 = arith.constant 0 : i32
    return %c0_i32, %c0_i32_0 : i32, i32
  }
  func.func @transform_2(%arg0: i32, %arg1: i32) -> (i32, i32) {
    %c0_i32 = arith.constant 0 : i32
    %c0_i32_0 = arith.constant 0 : i32
    return %arg0, %c0_i32 : i32, i32
  }
}

</mosaic_0001>

<bundles_post_ra>
// kernel: lstm_forward.1
= control target key start
LH: loop header
LB: loop body
LE: loop exit
PB: predicated region body
PF: predicated region fallthrough
CT: control target
= control target key end

     0   :  { %v1496_v1 = vmov 0   ;;  %v1497_v2 = vmov 0.0   ;;  %v1498_v36 = vmov 1983009808   ;;  %v306_v38 = vlaneseq  ;;  %s2082_s1 = inlined_call_operand.vmem [shape: bf16[128,512], index: 1, kind: input, shape index: {}]   ;;  %s2083_s0 = inlined_call_operand.vmem [shape: bf16[8,2,512], index: 0, kind: input, shape index: {}]   ;;  %s2084_s2 = inlined_call_operand.vmem [shape: f32[2,128], index: 2, kind: output, shape index: {}]  }
   0x1   :  { %v1517_v0 = vld [vmem:[%s2082_s1 + $0x4] ss:$16 sps:$4 sm:$0xff]   ;;  %247 = vmatprep.mubr.bf16.mxu0 %v1496_v1  ;;  %288 = vmatprep.mubr.bf16.mxu1 %v1496_v1  ;;  %16 = vst [vmem:[#allocation2] sm:$0x3] %v1497_v2  ;;  %17 = vst [vmem:[#allocation3] sm:$0x3] %v1497_v2  ;;  %v304_v37 = vunpack.c.l.s4 %v1498_v36 }
   0x2   :  { %v1524_v3 = vld [vmem:[%s2082_s1 + $0xc] ss:$16 sps:$4 sm:$0xff]   ;;  %215 = vmatprep.subr.bf16.mxu0 %v1517_v0  ;;  %v1530_v4 = vld [vmem:[%s2082_s1] ss:$16 sps:$4 sm:$0xff]   ;;  %v1535_v5 = vld [vmem:[%s2082_s1 + $0x8] ss:$16 sps:$4 sm:$0xff]  }
   0x3   :  { %256 = vmatprep.subr.bf16.mxu1 %v1524_v3  ;;  %v1541_v6 = vld [vmem:[%s2082_s1 + $0x24] ss:$16 sps:$4 sm:$0xff]   ;;  %216 = vmatpush1.bf16.msra.mxu0 %v1530_v4  ;;  %v1548_v7 = vld [vmem:[%s2082_s1 + $0x2c] ss:$16 sps:$4 sm:$0xff]   ;;  %v1553_v8 = vld [vmem:[%s2082_s1 + $0x20] ss:$16 sps:$4 sm:$0xff]   ;;  %v305_v39 = vunpack.c.0.s8 %v304_v37 }
   0x4   :  { %257 = vmatpush1.bf16.msra.mxu1 %v1535_v5  ;;  %217 = vmatprep.subr.bf16.mxu0 %v1541_v6  ;;  %v1559_v9 = vld [vmem:[%s2082_s1 + $0x28] ss:$16 sps:$4 sm:$0xff]   ;;  %v1565_v10 = vld [vmem:[%s2082_s1 + $0x44] ss:$16 sps:$4 sm:$0xff]   ;;  %v1570_v11 = vld [vmem:[%s2082_s1 + $0x4c] ss:$16 sps:$4 sm:$0xff]  }
   0x5   :  { %258 = vmatprep.subr.bf16.mxu1 %v1548_v7  ;;  %v1575_v12 = vld [vmem:[%s2082_s1 + $0x40] ss:$16 sps:$4 sm:$0xff]   ;;  %v1580_v13 = vld [vmem:[%s2082_s1 + $0x48] ss:$16 sps:$4 sm:$0xff]   ;;  %v1587_v14 = vld [vmem:[%s2082_s1 + $0x64] ss:$16 sps:$4 sm:$0xff]  }
   0x6   :  { %v1594_v15 = vld [vmem:[%s2082_s1 + $0x6c] ss:$16 sps:$4 sm:$0xff]   ;;  %v1599_v16 = vld [vmem:[%s2082_s1 + $0x60] ss:$16 sps:$4 sm:$0xff]   ;;  %v1606_v17 = vld [vmem:[%s2082_s1 + $0x68] ss:$16 sps:$4 sm:$0xff]  }
   0x7   :  { %218 = vmatpush1.bf16.msra.mxu0 %v1553_v8  ;;  %v1611_v18 = vld [vmem:[%s2082_s1 + $0x84] ss:$16 sps:$4 sm:$0xff]   ;;  %v1618_v19 = vld [vmem:[%s2082_s1 + $0x8c] ss:$16 sps:$4 sm:$0xff]   ;;  %v1623_v20 = vld [vmem:[%s2082_s1 + $0x80] ss:$16 sps:$4 sm:$0xff]  }
   0x8   :  { %259 = vmatpush1.bf16.msra.mxu1 %v1559_v9  ;;  %219 = vmatprep.subr.bf16.mxu0 %v1565_v10  ;;  %v1628_v21 = vld [vmem:[%s2082_s1 + $0x88] ss:$16 sps:$4 sm:$0xff]   ;;  %v1635_v22 = vld [vmem:[%s2082_s1 + $0xa4] ss:$16 sps:$4 sm:$0xff]   ;;  %v1642_v23 = vld [vmem:[%s2082_s1 + $0xac] ss:$16 sps:$4 sm:$0xff]  }
   0x9   :  { %260 = vmatprep.subr.bf16.mxu1 %v1570_v11  ;;  %v1649_v24 = vld [vmem:[%s2082_s1 + $0xa0] ss:$16 sps:$4 sm:$0xff]   ;;  %v1654_v25 = vld [vmem:[%s2082_s1 + $0xa8] ss:$16 sps:$4 sm:$0xff]   ;;  %v1661_v26 = vld [vmem:[%s2082_s1 + $0xc4] ss:$16 sps:$4 sm:$0xff]  }
   0xa   :  { %v1666_v27 = vld [vmem:[%s2082_s1 + $0xcc] ss:$16 sps:$4 sm:$0xff]   ;;  %v1673_v28 = vld [vmem:[%s2082_s1 + $0xc0] ss:$16 sps:$4 sm:$0xff]   ;;  %v1678_v29 = vld [vmem:[%s2082_s1 + $0xc8] ss:$16 sps:$4 sm:$0xff]  }
   0xb   :  { %220 = vmatpush1.bf16.msra.mxu0 %v1575_v12  ;;  %v1685_v30 = vld [vmem:[%s2082_s1 + $0xe4] ss:$16 sps:$4 sm:$0xff]   ;;  %v1690_v31 = vld [vmem:[%s2082_s1 + $0xec] ss:$16 sps:$4 sm:$0xff]   ;;  %v1697_v32 = vld [vmem:[%s2082_s1 + $0xe0] ss:$16 sps:$4 sm:$0xff]  }
   0xc   :  { %261 = vmatpush1.bf16.msra.mxu1 %v1580_v13  ;;  %221 = vmatprep.subr.bf16.mxu0 %v1587_v14  ;;  %v1702_v33 = vld [vmem:[%s2082_s1 + $0xe8] ss:$16 sps:$4 sm:$0xff]   ;;  %v50_v34 = vld [vmem:[#allocation2] sm:$0x3]  ;;  %v307_v40 = vshrl.u32 %v306_v38, 7 }
   0xd   :  { %262 = vmatprep.subr.bf16.mxu1 %v1594_v15  ;;  %v52_v35 = vpack.c.bf16 %v50_v34, %v50_v34  ;;  %v1749_v45 = vld [vmem:[%s2083_s0] sm:$0xff]  }
   0xe   :  { %v1744_v43 = vsub.s32 %v305_v39, %v307_v40  ;;  %v54_v54 = vunpack.c.l.bf16 %v1749_v45  ;;  %v51_v38 = vld [vmem:[#allocation3] sm:$0x3] }
   0xf   :  { %222 = vmatpush1.bf16.msra.mxu0 %v1599_v16 }
  0x10   :  { %263 = vmatpush1.bf16.msra.mxu1 %v1606_v17  ;;  %223 = vmatprep.subr.bf16.mxu0 %v1611_v18 }
  0x11   :  { %264 = vmatprep.subr.bf16.mxu1 %v1618_v19 }
  0x13   :  { %224 = vmatpush1.bf16.msra.mxu0 %v1623_v20 }
  0x14   :  { %265 = vmatpush1.bf16.msra.mxu1 %v1628_v21  ;;  %225 = vmatprep.subr.bf16.mxu0 %v1635_v22 }
  0x15   :  { %266 = vmatprep.subr.bf16.mxu1 %v1642_v23 }
  0x17   :  { %226 = vmatpush1.bf16.msra.mxu0 %v1649_v24 }
  0x18   :  { %267 = vmatpush1.bf16.msra.mxu1 %v1654_v25  ;;  %227 = vmatprep.subr.bf16.mxu0 %v1661_v26 }
  0x19   :  { %268 = vmatprep.subr.bf16.mxu1 %v1666_v27 }
  0x1b   :  { %228 = vmatpush1.bf16.msra.mxu0 %v1673_v28 }
  0x1c   :  { %269 = vmatpush1.bf16.msra.mxu1 %v1678_v29  ;;  %229 = vmatprep.subr.bf16.mxu0 %v1685_v30 }
  0x1d   :  { %270 = vmatprep.subr.bf16.mxu1 %v1690_v31 }
  0x1f   :  { %230 = vmatpush1.bf16.msra.mxu0 %v1697_v32 }
  0x20   :  { %271 = vmatpush1.bf16.msra.mxu1 %v1702_v33  ;;  %349 = vmatprep.subr.bf16.mxu0 %v1517_v0 }
  0x21   :  { %390 = vmatprep.subr.bf16.mxu1 %v1524_v3 }
  0x22   :  { %248 = vmatmul.mubr.bf16.vlgmr.msra.gmra.mrb[0].mxu0 %v52_v35 }
  0x23   :  { %289 = vmatmul.mubr.bf16.vlgmr.msra.gmra.mrb[0].mxu1 %v52_v35  ;;  %350 = vmatpush1.bf16.msra.mxu0 %v1530_v4 }
  0x24   :  { %391 = vmatpush1.bf16.msra.mxu1 %v1535_v5  ;;  %351 = vmatprep.subr.bf16.mxu0 %v1541_v6 }
  0x25   :  { %392 = vmatprep.subr.bf16.mxu1 %v1548_v7  ;;  %381 = vmatprep.mubr.bf16.mxu0 %v1496_v1 }
  0x26   :  { %422 = vmatprep.mubr.bf16.mxu1 %v1496_v1 }
  0x27   :  { %352 = vmatpush1.bf16.msra.mxu0 %v1553_v8 }
  0x28   :  { %393 = vmatpush1.bf16.msra.mxu1 %v1559_v9  ;;  %353 = vmatprep.subr.bf16.mxu0 %v1565_v10 }
  0x29   :  { %394 = vmatprep.subr.bf16.mxu1 %v1570_v11 }
  0x2b   :  { %354 = vmatpush1.bf16.msra.mxu0 %v1575_v12 }
  0x2c   :  { %395 = vmatpush1.bf16.msra.mxu1 %v1580_v13  ;;  %355 = vmatprep.subr.bf16.mxu0 %v1587_v14 }
  0x2d   :  { %396 = vmatprep.subr.bf16.mxu1 %v1594_v15 }
  0x2f   :  { %356 = vmatpush1.bf16.msra.mxu0 %v1599_v16 }
  0x30   :  { %397 = vmatpush1.bf16.msra.mxu1 %v1606_v17  ;;  %357 = vmatprep.subr.bf16.mxu0 %v1611_v18 }
  0x31   :  { %398 = vmatprep.subr.bf16.mxu1 %v1618_v19 }
  0x33   :  { %358 = vmatpush1.bf16.msra.mxu0 %v1623_v20 }
  0x34   :  { %399 = vmatpush1.bf16.msra.mxu1 %v1628_v21  ;;  %359 = vmatprep.subr.bf16.mxu0 %v1635_v22 }
  0x35   :  { %400 = vmatprep.subr.bf16.mxu1 %v1642_v23 }
  0x37   :  { %360 = vmatpush1.bf16.msra.mxu0 %v1649_v24 }
  0x38   :  { %401 = vmatpush1.bf16.msra.mxu1 %v1654_v25  ;;  %361 = vmatprep.subr.bf16.mxu0 %v1661_v26 }
  0x39   :  { %402 = vmatprep.subr.bf16.mxu1 %v1666_v27 }
  0x3b   :  { %362 = vmatpush1.bf16.msra.mxu0 %v1673_v28 }
  0x3c   :  { %403 = vmatpush1.bf16.msra.mxu1 %v1678_v29  ;;  %363 = vmatprep.subr.bf16.mxu0 %v1685_v30 }
  0x3d   :  { %404 = vmatprep.subr.bf16.mxu1 %v1690_v31 }
  0x3f   :  { %364 = vmatpush1.bf16.msra.mxu0 %v1697_v32 }
  0x40   :  { %405 = vmatpush1.bf16.msra.mxu1 %v1702_v33  ;;  %483 = vmatprep.subr.bf16.mxu0 %v1517_v0 }
  0x41   :  { %524 = vmatprep.subr.bf16.mxu1 %v1524_v3 }
  0xf5   :  { %v249_v41 = vpop.f32.mrb[0].mxu0 }
  0xf6   :  { %v290_v42 = vpop.f32.mrb[0].mxu1  ;;  %v251_v44 = vpop.f32.mrb[1].mxu0 }
  0xf7   :  { %v292_v46 = vpop.f32.mrb[1].mxu1  ;;  %v301_v47 = vcombine.low %v249_v41, %v251_v44  ;;  %v253_v49 = vpop.f32.mrb[2].mxu0 }
  0xf8   :  { %v302_v48 = vcombine.low %v290_v42, %v292_v46  ;;  %v294_v50 = vpop.f32.mrb[2].mxu1  ;;  %v254_v51 = vpop.f32.mrb[3].mxu0 }
  0xf9   :  { %v295_v52 = vpop.f32.mrb[3].mxu1  ;;  %v309_v53 = vrot.slane %v301_v47, %v1744_v43 }
  0xfa   :  { %v316_v55 = vrot.slane %v302_v48, %v1744_v43 }
  0xfc   :  { %v317_v56 = vcombine.low %v309_v53, %v316_v55 }
  0xfe   :  { %v319_v57 = vadd.f32 %v317_v56, %v54_v54 }
 0x100   :  { %v320_v58 = vmul.f32 0.5, %v319_v57  ;;  %v325_v59 = vrot.slane %v319_v57, 2  ;;  %v331_v61 = vrot.slane %v319_v57, 4  ;;  %v337_v62 = vrot.slane %v319_v57, 6 }
 0x102   :  { %1384 = vtanh.f32 %v320_v58  ;;  %v327_v60 = vmul.f32 0.5, %v325_v59  ;;  %v339_v63 = vmul.f32 0.5, %v337_v62 }
 0x104   :  { %1386 = vtanh.f32 %v327_v60 }
 0x105   :  { %1388 = vtanh.f32 %v331_v61 }
 0x106   :  { %1390 = vtanh.f32 %v339_v63  ;;  %v348_v63 = vunpack.c.h.bf16 %v1749_v45 }
 0x10c   :  { %v1385_v2 = vpop.eup %1384 }
 0x10d   :  { %v322_v34 = vmul.f32 0.5, %v1385_v2 }
 0x10e   :  { %v1387_v35 = vpop.eup %1386 }
 0x10f   :  { %v323_v36 = vadd.f32 0.5, %v322_v34  ;;  %v329_v37 = vmul.f32 0.5, %v1387_v35  ;;  %v1389_v40 = vpop.eup %1388 }
 0x110   :  { %v1391_v46 = vpop.eup %1390 }
 0x111   :  { %v330_v39 = vadd.f32 0.5, %v329_v37  ;;  %v335_v42 = vmul.f32 %v1389_v40, %v323_v36  ;;  %v341_v47 = vmul.f32 0.5, %v1391_v46 }
 0x113   :  { %v334_v41 = vmul.f32 %v330_v39, %v51_v38  ;;  %v342_v48 = vadd.f32 0.5, %v341_v47 }
 0x115   :  { %v1754_v44 = vadd.f32 %v335_v42, %v334_v41 }
 0x117   :  { %1392 = vtanh.f32 %v1754_v44 }
 0x121   :  { %v1393_v49 = vpop.eup %1392 }
 0x122   :  { %v344_v50 = vmul.f32 %v1393_v49, %v342_v48 }
 0x124   :  { %v345_v51 = vpack.c.bf16 %v344_v50, %v344_v50 }
 0x126   :  { %382 = vmatmul.mubr.bf16.vlgmr.msra.gmra.mrb[4].mxu0 %v345_v51  ;;  %423 = vmatmul.mubr.bf16.vlgmr.msra.gmra.mrb[4].mxu1 %v345_v51 }
 0x127   :  { %484 = vmatpush1.bf16.msra.mxu0 %v1530_v4  ;;  %525 = vmatpush1.bf16.msra.mxu1 %v1535_v5 }
 0x128   :  { %485 = vmatprep.subr.bf16.mxu0 %v1541_v6  ;;  %526 = vmatprep.subr.bf16.mxu1 %v1548_v7 }
 0x129   :  { %515 = vmatprep.mubr.bf16.mxu0 %v1496_v1  ;;  %556 = vmatprep.mubr.bf16.mxu1 %v1496_v1 }
 0x12b   :  { %486 = vmatpush1.bf16.msra.mxu0 %v1553_v8  ;;  %527 = vmatpush1.bf16.msra.mxu1 %v1559_v9 }
 0x12c   :  { %487 = vmatprep.subr.bf16.mxu0 %v1565_v10  ;;  %528 = vmatprep.subr.bf16.mxu1 %v1570_v11 }
 0x12f   :  { %488 = vmatpush1.bf16.msra.mxu0 %v1575_v12  ;;  %529 = vmatpush1.bf16.msra.mxu1 %v1580_v13 }
 0x130   :  { %489 = vmatprep.subr.bf16.mxu0 %v1587_v14  ;;  %530 = vmatprep.subr.bf16.mxu1 %v1594_v15 }
 0x133   :  { %490 = vmatpush1.bf16.msra.mxu0 %v1599_v16  ;;  %531 = vmatpush1.bf16.msra.mxu1 %v1606_v17 }
 0x134   :  { %491 = vmatprep.subr.bf16.mxu0 %v1611_v18  ;;  %532 = vmatprep.subr.bf16.mxu1 %v1618_v19 }
 0x137   :  { %492 = vmatpush1.bf16.msra.mxu0 %v1623_v20  ;;  %533 = vmatpush1.bf16.msra.mxu1 %v1628_v21 }
 0x138   :  { %493 = vmatprep.subr.bf16.mxu0 %v1635_v22  ;;  %534 = vmatprep.subr.bf16.mxu1 %v1642_v23 }
 0x13b   :  { %494 = vmatpush1.bf16.msra.mxu0 %v1649_v24  ;;  %535 = vmatpush1.bf16.msra.mxu1 %v1654_v25 }
 0x13c   :  { %495 = vmatprep.subr.bf16.mxu0 %v1661_v26  ;;  %536 = vmatprep.subr.bf16.mxu1 %v1666_v27 }
 0x13f   :  { %496 = vmatpush1.bf16.msra.mxu0 %v1673_v28  ;;  %537 = vmatpush1.bf16.msra.mxu1 %v1678_v29 }
 0x140   :  { %497 = vmatprep.subr.bf16.mxu0 %v1685_v30  ;;  %538 = vmatprep.subr.bf16.mxu1 %v1690_v31 }
 0x143   :  { %498 = vmatpush1.bf16.msra.mxu0 %v1697_v32  ;;  %539 = vmatpush1.bf16.msra.mxu1 %v1702_v33 }
 0x144   :  { %617 = vmatprep.subr.bf16.mxu0 %v1517_v0  ;;  %658 = vmatprep.subr.bf16.mxu1 %v1524_v3 }
 0x1f9   :  { %v383_v52 = vpop.f32.mrb[4].mxu0  ;;  %v424_v53 = vpop.f32.mrb[4].mxu1 }
 0x1fa   :  { %v385_v54 = vpop.f32.mrb[5].mxu0  ;;  %v426_v55 = vpop.f32.mrb[5].mxu1 }
 0x1fb   :  { %v435_v56 = vcombine.low %v383_v52, %v385_v54  ;;  %v436_v57 = vcombine.low %v424_v53, %v426_v55  ;;  %v387_v58 = vpop.f32.mrb[6].mxu0  ;;  %v428_v59 = vpop.f32.mrb[6].mxu1 }
 0x1fc   :  { %v388_v60 = vpop.f32.mrb[7].mxu0  ;;  %v429_v61 = vpop.f32.mrb[7].mxu1 }
 0x1fd   :  { %v443_v62 = vrot.slane %v435_v56, %v1744_v43  ;;  %v450_v2 = vrot.slane %v436_v57, %v1744_v43 }
 0x1ff   :  { %v451_v34 = vcombine.low %v443_v62, %v450_v2  ;;  %v1835_v62 = vld [vmem:[%s2083_s0 + $0x8] sm:$0xff]  }
 0x201   :  { %v453_v35 = vadd.f32 %v451_v34, %v348_v63 }
 0x203   :  { %v454_v36 = vmul.f32 0.5, %v453_v35  ;;  %v459_v37 = vrot.slane %v453_v35, 2  ;;  %v465_v39 = vrot.slane %v453_v35, 4  ;;  %v471_v40 = vrot.slane %v453_v35, 6 }
 0x205   :  { %1394 = vtanh.f32 %v454_v36  ;;  %v461_v38 = vmul.f32 0.5, %v459_v37  ;;  %v473_v41 = vmul.f32 0.5, %v471_v40  ;;  %v482_v40 = vunpack.c.l.bf16 %v1835_v62 }
 0x207   :  { %1396 = vtanh.f32 %v461_v38 }
 0x208   :  { %1398 = vtanh.f32 %v465_v39 }
 0x209   :  { %1400 = vtanh.f32 %v473_v41 }
 0x20f   :  { %v1395_v42 = vpop.eup %1394 }
 0x210   :  { %v456_v46 = vmul.f32 0.5, %v1395_v42 }
 0x211   :  { %v1397_v47 = vpop.eup %1396 }
 0x212   :  { %v457_v48 = vadd.f32 0.5, %v456_v46  ;;  %v463_v49 = vmul.f32 0.5, %v1397_v47  ;;  %v1399_v50 = vpop.eup %1398 }
 0x213   :  { %v1401_v54 = vpop.eup %1400 }
 0x214   :  { %v464_v45 = vadd.f32 0.5, %v463_v49  ;;  %v469_v52 = vmul.f32 %v1399_v50, %v457_v48  ;;  %v475_v55 = vmul.f32 0.5, %v1401_v54 }
 0x216   :  { %v468_v51 = vmul.f32 %v464_v45, %v1754_v44  ;;  %v476_v56 = vadd.f32 0.5, %v475_v55 }
 0x218   :  { %v1795_v53 = vadd.f32 %v469_v52, %v468_v51 }
 0x21a   :  { %1402 = vtanh.f32 %v1795_v53 }
 0x224   :  { %v1403_v57 = vpop.eup %1402 }
 0x225   :  { %v478_v58 = vmul.f32 %v1403_v57, %v476_v56 }
 0x227   :  { %v479_v59 = vpack.c.bf16 %v478_v58, %v478_v58 }
 0x229   :  { %516 = vmatmul.mubr.bf16.vlgmr.msra.gmra.mrb[8].mxu0 %v479_v59  ;;  %557 = vmatmul.mubr.bf16.vlgmr.msra.gmra.mrb[8].mxu1 %v479_v59 }
 0x22a   :  { %618 = vmatpush1.bf16.msra.mxu0 %v1530_v4  ;;  %659 = vmatpush1.bf16.msra.mxu1 %v1535_v5 }
 0x22b   :  { %619 = vmatprep.subr.bf16.mxu0 %v1541_v6  ;;  %660 = vmatprep.subr.bf16.mxu1 %v1548_v7 }
 0x22c   :  { %649 = vmatprep.mubr.bf16.mxu0 %v1496_v1  ;;  %690 = vmatprep.mubr.bf16.mxu1 %v1496_v1 }
 0x22e   :  { %620 = vmatpush1.bf16.msra.mxu0 %v1553_v8  ;;  %661 = vmatpush1.bf16.msra.mxu1 %v1559_v9 }
 0x22f   :  { %621 = vmatprep.subr.bf16.mxu0 %v1565_v10  ;;  %662 = vmatprep.subr.bf16.mxu1 %v1570_v11 }
 0x232   :  { %622 = vmatpush1.bf16.msra.mxu0 %v1575_v12  ;;  %663 = vmatpush1.bf16.msra.mxu1 %v1580_v13 }
 0x233   :  { %623 = vmatprep.subr.bf16.mxu0 %v1587_v14  ;;  %664 = vmatprep.subr.bf16.mxu1 %v1594_v15 }
 0x236   :  { %624 = vmatpush1.bf16.msra.mxu0 %v1599_v16  ;;  %665 = vmatpush1.bf16.msra.mxu1 %v1606_v17 }
 0x237   :  { %625 = vmatprep.subr.bf16.mxu0 %v1611_v18  ;;  %666 = vmatprep.subr.bf16.mxu1 %v1618_v19 }
 0x23a   :  { %626 = vmatpush1.bf16.msra.mxu0 %v1623_v20  ;;  %667 = vmatpush1.bf16.msra.mxu1 %v1628_v21 }
 0x23b   :  { %627 = vmatprep.subr.bf16.mxu0 %v1635_v22  ;;  %668 = vmatprep.subr.bf16.mxu1 %v1642_v23 }
 0x23e   :  { %628 = vmatpush1.bf16.msra.mxu0 %v1649_v24  ;;  %669 = vmatpush1.bf16.msra.mxu1 %v1654_v25 }
 0x23f   :  { %629 = vmatprep.subr.bf16.mxu0 %v1661_v26  ;;  %670 = vmatprep.subr.bf16.mxu1 %v1666_v27 }
 0x242   :  { %630 = vmatpush1.bf16.msra.mxu0 %v1673_v28  ;;  %671 = vmatpush1.bf16.msra.mxu1 %v1678_v29 }
 0x243   :  { %631 = vmatprep.subr.bf16.mxu0 %v1685_v30  ;;  %672 = vmatprep.subr.bf16.mxu1 %v1690_v31 }
 0x246   :  { %632 = vmatpush1.bf16.msra.mxu0 %v1697_v32  ;;  %673 = vmatpush1.bf16.msra.mxu1 %v1702_v33 }
 0x247   :  { %751 = vmatprep.subr.bf16.mxu0 %v1517_v0  ;;  %792 = vmatprep.subr.bf16.mxu1 %v1524_v3 }
 0x2fc   :  { %v517_v44 = vpop.f32.mrb[8].mxu0  ;;  %v558_v60 = vpop.f32.mrb[8].mxu1 }
 0x2fd   :  { %v519_v61 = vpop.f32.mrb[9].mxu0  ;;  %v560_v63 = vpop.f32.mrb[9].mxu1 }
 0x2fe   :  { %v569_v2 = vcombine.low %v517_v44, %v519_v61  ;;  %v570_v34 = vcombine.low %v558_v60, %v560_v63  ;;  %v521_v35 = vpop.f32.mrb[10].mxu0  ;;  %v562_v36 = vpop.f32.mrb[10].mxu1 }
 0x2ff   :  { %v522_v37 = vpop.f32.mrb[11].mxu0  ;;  %v563_v38 = vpop.f32.mrb[11].mxu1 }
 0x300   :  { %v577_v39 = vrot.slane %v569_v2, %v1744_v43  ;;  %v584_v41 = vrot.slane %v570_v34, %v1744_v43 }
 0x302   :  { %v585_v42 = vcombine.low %v577_v39, %v584_v41 }
 0x304   :  { %v587_v46 = vadd.f32 %v585_v42, %v482_v40 }
 0x306   :  { %v588_v47 = vmul.f32 0.5, %v587_v46  ;;  %v593_v48 = vrot.slane %v587_v46, 2  ;;  %v599_v45 = vrot.slane %v587_v46, 4  ;;  %v605_v50 = vrot.slane %v587_v46, 6 }
 0x308   :  { %1404 = vtanh.f32 %v588_v47  ;;  %v595_v49 = vmul.f32 0.5, %v593_v48  ;;  %v607_v51 = vmul.f32 0.5, %v605_v50  ;;  %v616_v50 = vunpack.c.h.bf16 %v1835_v62 }
 0x30a   :  { %1406 = vtanh.f32 %v595_v49 }
 0x30b   :  { %1408 = vtanh.f32 %v599_v45 }
 0x30c   :  { %1410 = vtanh.f32 %v607_v51 }
 0x312   :  { %v1405_v52 = vpop.eup %1404 }
 0x313   :  { %v590_v54 = vmul.f32 0.5, %v1405_v52 }
 0x314   :  { %v1407_v55 = vpop.eup %1406 }
 0x315   :  { %v591_v56 = vadd.f32 0.5, %v590_v54  ;;  %v597_v57 = vmul.f32 0.5, %v1407_v55  ;;  %v1409_v59 = vpop.eup %1408 }
 0x316   :  { %v1411_v63 = vpop.eup %1410 }
 0x317   :  { %v598_v58 = vadd.f32 0.5, %v597_v57  ;;  %v603_v60 = vmul.f32 %v1409_v59, %v591_v56  ;;  %v609_v2 = vmul.f32 0.5, %v1411_v63 }
 0x319   :  { %v602_v44 = vmul.f32 %v598_v58, %v1795_v53  ;;  %v610_v34 = vadd.f32 0.5, %v609_v2 }
 0x31b   :  { %v1841_v61 = vadd.f32 %v603_v60, %v602_v44 }
 0x31d   :  { %1412 = vtanh.f32 %v1841_v61 }
 0x327   :  { %v1413_v35 = vpop.eup %1412 }
 0x328   :  { %v612_v36 = vmul.f32 %v1413_v35, %v610_v34 }
 0x32a   :  { %v613_v37 = vpack.c.bf16 %v612_v36, %v612_v36 }
 0x32c   :  { %650 = vmatmul.mubr.bf16.vlgmr.msra.gmra.mrb[12].mxu0 %v613_v37  ;;  %691 = vmatmul.mubr.bf16.vlgmr.msra.gmra.mrb[12].mxu1 %v613_v37 }
 0x32d   :  { %752 = vmatpush1.bf16.msra.mxu0 %v1530_v4  ;;  %793 = vmatpush1.bf16.msra.mxu1 %v1535_v5 }
 0x32e   :  { %753 = vmatprep.subr.bf16.mxu0 %v1541_v6  ;;  %794 = vmatprep.subr.bf16.mxu1 %v1548_v7 }
 0x32f   :  { %783 = vmatprep.mubr.bf16.mxu0 %v1496_v1  ;;  %824 = vmatprep.mubr.bf16.mxu1 %v1496_v1 }
 0x331   :  { %754 = vmatpush1.bf16.msra.mxu0 %v1553_v8  ;;  %795 = vmatpush1.bf16.msra.mxu1 %v1559_v9 }
 0x332   :  { %755 = vmatprep.subr.bf16.mxu0 %v1565_v10  ;;  %796 = vmatprep.subr.bf16.mxu1 %v1570_v11 }
 0x335   :  { %756 = vmatpush1.bf16.msra.mxu0 %v1575_v12  ;;  %797 = vmatpush1.bf16.msra.mxu1 %v1580_v13 }
 0x336   :  { %757 = vmatprep.subr.bf16.mxu0 %v1587_v14  ;;  %798 = vmatprep.subr.bf16.mxu1 %v1594_v15 }
 0x339   :  { %758 = vmatpush1.bf16.msra.mxu0 %v1599_v16  ;;  %799 = vmatpush1.bf16.msra.mxu1 %v1606_v17 }
 0x33a   :  { %759 = vmatprep.subr.bf16.mxu0 %v1611_v18  ;;  %800 = vmatprep.subr.bf16.mxu1 %v1618_v19 }
 0x33d   :  { %760 = vmatpush1.bf16.msra.mxu0 %v1623_v20  ;;  %801 = vmatpush1.bf16.msra.mxu1 %v1628_v21 }
 0x33e   :  { %761 = vmatprep.subr.bf16.mxu0 %v1635_v22  ;;  %802 = vmatprep.subr.bf16.mxu1 %v1642_v23 }
 0x341   :  { %762 = vmatpush1.bf16.msra.mxu0 %v1649_v24  ;;  %803 = vmatpush1.bf16.msra.mxu1 %v1654_v25 }
 0x342   :  { %763 = vmatprep.subr.bf16.mxu0 %v1661_v26  ;;  %804 = vmatprep.subr.bf16.mxu1 %v1666_v27 }
 0x345   :  { %764 = vmatpush1.bf16.msra.mxu0 %v1673_v28  ;;  %805 = vmatpush1.bf16.msra.mxu1 %v1678_v29 }
 0x346   :  { %765 = vmatprep.subr.bf16.mxu0 %v1685_v30  ;;  %806 = vmatprep.subr.bf16.mxu1 %v1690_v31 }
 0x349   :  { %766 = vmatpush1.bf16.msra.mxu0 %v1697_v32  ;;  %807 = vmatpush1.bf16.msra.mxu1 %v1702_v33 }
 0x34a   :  { %885 = vmatprep.subr.bf16.mxu0 %v1517_v0  ;;  %926 = vmatprep.subr.bf16.mxu1 %v1524_v3 }
 0x3ff   :  { %v651_v53 = vpop.f32.mrb[12].mxu0  ;;  %v692_v38 = vpop.f32.mrb[12].mxu1 }
 0x400   :  { %v653_v39 = vpop.f32.mrb[13].mxu0  ;;  %v694_v40 = vpop.f32.mrb[13].mxu1 }
 0x401   :  { %v703_v41 = vcombine.low %v651_v53, %v653_v39  ;;  %v704_v42 = vcombine.low %v692_v38, %v694_v40  ;;  %v655_v46 = vpop.f32.mrb[14].mxu0  ;;  %v696_v47 = vpop.f32.mrb[14].mxu1 }
 0x402   :  { %v656_v48 = vpop.f32.mrb[15].mxu0  ;;  %v697_v49 = vpop.f32.mrb[15].mxu1 }
 0x403   :  { %v711_v45 = vrot.slane %v703_v41, %v1744_v43  ;;  %v718_v51 = vrot.slane %v704_v42, %v1744_v43 }
 0x405   :  { %v719_v52 = vcombine.low %v711_v45, %v718_v51  ;;  %v1922_v45 = vld [vmem:[%s2083_s0 + $0x10] sm:$0xff]  }
 0x407   :  { %v721_v54 = vadd.f32 %v719_v52, %v616_v50 }
 0x409   :  { %v722_v55 = vmul.f32 0.5, %v721_v54  ;;  %v727_v56 = vrot.slane %v721_v54, 2  ;;  %v733_v58 = vrot.slane %v721_v54, 4  ;;  %v739_v59 = vrot.slane %v721_v54, 6 }
 0x40b   :  { %1414 = vtanh.f32 %v722_v55  ;;  %v729_v57 = vmul.f32 0.5, %v727_v56  ;;  %v741_v44 = vmul.f32 0.5, %v739_v59 }
 0x40d   :  { %1416 = vtanh.f32 %v729_v57 }
 0x40e   :  { %1418 = vtanh.f32 %v733_v58 }
 0x40f   :  { %1420 = vtanh.f32 %v741_v44 }
 0x415   :  { %v1415_v60 = vpop.eup %1414 }
 0x416   :  { %v724_v63 = vmul.f32 0.5, %v1415_v60 }
 0x417   :  { %v1417_v2 = vpop.eup %1416 }
 0x418   :  { %v725_v34 = vadd.f32 0.5, %v724_v63  ;;  %v731_v35 = vmul.f32 0.5, %v1417_v2  ;;  %v1419_v36 = vpop.eup %1418 }
 0x419   :  { %v1421_v39 = vpop.eup %1420 }
 0x41a   :  { %v732_v62 = vadd.f32 0.5, %v731_v35  ;;  %v737_v53 = vmul.f32 %v1419_v36, %v725_v34  ;;  %v743_v40 = vmul.f32 0.5, %v1421_v39 }
 0x41c   :  { %v736_v37 = vmul.f32 %v732_v62, %v1841_v61  ;;  %v744_v41 = vadd.f32 0.5, %v743_v40 }
 0x41e   :  { %v1882_v38 = vadd.f32 %v737_v53, %v736_v37 }
 0x420   :  { %1422 = vtanh.f32 %v1882_v38 }
 0x42a   :  { %v1423_v42 = vpop.eup %1422 }
 0x42b   :  { %v746_v46 = vmul.f32 %v1423_v42, %v744_v41 }
 0x42d   :  { %v747_v47 = vpack.c.bf16 %v746_v46, %v746_v46 }
 0x42f   :  { %784 = vmatmul.mubr.bf16.vlgmr.msra.gmra.mrb[16].mxu0 %v747_v47  ;;  %825 = vmatmul.mubr.bf16.vlgmr.msra.gmra.mrb[16].mxu1 %v747_v47 }
 0x430   :  { %886 = vmatpush1.bf16.msra.mxu0 %v1530_v4  ;;  %927 = vmatpush1.bf16.msra.mxu1 %v1535_v5 }
 0x431   :  { %887 = vmatprep.subr.bf16.mxu0 %v1541_v6  ;;  %928 = vmatprep.subr.bf16.mxu1 %v1548_v7 }
 0x432   :  { %917 = vmatprep.mubr.bf16.mxu0 %v1496_v1  ;;  %958 = vmatprep.mubr.bf16.mxu1 %v1496_v1 }
 0x434   :  { %888 = vmatpush1.bf16.msra.mxu0 %v1553_v8  ;;  %929 = vmatpush1.bf16.msra.mxu1 %v1559_v9 }
 0x435   :  { %889 = vmatprep.subr.bf16.mxu0 %v1565_v10  ;;  %930 = vmatprep.subr.bf16.mxu1 %v1570_v11 }
 0x438   :  { %890 = vmatpush1.bf16.msra.mxu0 %v1575_v12  ;;  %931 = vmatpush1.bf16.msra.mxu1 %v1580_v13 }
 0x439   :  { %891 = vmatprep.subr.bf16.mxu0 %v1587_v14  ;;  %932 = vmatprep.subr.bf16.mxu1 %v1594_v15 }
 0x43c   :  { %892 = vmatpush1.bf16.msra.mxu0 %v1599_v16  ;;  %933 = vmatpush1.bf16.msra.mxu1 %v1606_v17 }
 0x43d   :  { %893 = vmatprep.subr.bf16.mxu0 %v1611_v18  ;;  %934 = vmatprep.subr.bf16.mxu1 %v1618_v19 }
 0x440   :  { %894 = vmatpush1.bf16.msra.mxu0 %v1623_v20  ;;  %935 = vmatpush1.bf16.msra.mxu1 %v1628_v21 }
 0x441   :  { %895 = vmatprep.subr.bf16.mxu0 %v1635_v22  ;;  %936 = vmatprep.subr.bf16.mxu1 %v1642_v23 }
 0x444   :  { %896 = vmatpush1.bf16.msra.mxu0 %v1649_v24  ;;  %937 = vmatpush1.bf16.msra.mxu1 %v1654_v25 }
 0x445   :  { %897 = vmatprep.subr.bf16.mxu0 %v1661_v26  ;;  %938 = vmatprep.subr.bf16.mxu1 %v1666_v27 }
 0x448   :  { %898 = vmatpush1.bf16.msra.mxu0 %v1673_v28  ;;  %939 = vmatpush1.bf16.msra.mxu1 %v1678_v29 }
 0x449   :  { %899 = vmatprep.subr.bf16.mxu0 %v1685_v30  ;;  %940 = vmatprep.subr.bf16.mxu1 %v1690_v31 }
 0x44c   :  { %900 = vmatpush1.bf16.msra.mxu0 %v1697_v32  ;;  %941 = vmatpush1.bf16.msra.mxu1 %v1702_v33 }
 0x44d   :  { %1019 = vmatprep.subr.bf16.mxu0 %v1517_v0  ;;  %1060 = vmatprep.subr.bf16.mxu1 %v1524_v3  ;;  %v750_v0 = vunpack.c.l.bf16 %v1922_v45 }
 0x502   :  { %v785_v61 = vpop.f32.mrb[16].mxu0  ;;  %v826_v48 = vpop.f32.mrb[16].mxu1 }
 0x503   :  { %v787_v49 = vpop.f32.mrb[17].mxu0  ;;  %v828_v50 = vpop.f32.mrb[17].mxu1 }
 0x504   :  { %v837_v51 = vcombine.low %v785_v61, %v787_v49  ;;  %v838_v52 = vcombine.low %v826_v48, %v828_v50  ;;  %v789_v54 = vpop.f32.mrb[18].mxu0  ;;  %v830_v55 = vpop.f32.mrb[18].mxu1 }
 0x505   :  { %v790_v56 = vpop.f32.mrb[19].mxu0  ;;  %v831_v57 = vpop.f32.mrb[19].mxu1 }
 0x506   :  { %v845_v58 = vrot.slane %v837_v51, %v1744_v43  ;;  %v852_v3 = vrot.slane %v838_v52, %v1744_v43 }
 0x508   :  { %v853_v59 = vcombine.low %v845_v58, %v852_v3 }
 0x50a   :  { %v855_v44 = vadd.f32 %v853_v59, %v750_v0 }
 0x50c   :  { %v856_v60 = vmul.f32 0.5, %v855_v44  ;;  %v861_v63 = vrot.slane %v855_v44, 2  ;;  %v867_v34 = vrot.slane %v855_v44, 4  ;;  %v873_v35 = vrot.slane %v855_v44, 6  ;;  %v1466_v44 = vld [vmem:[%s2082_s1] ss:$16 sps:$4 sm:$0xff]  }
 0x50e   :  { %1424 = vtanh.f32 %v856_v60  ;;  %v863_v2 = vmul.f32 0.5, %v861_v63  ;;  %v875_v62 = vmul.f32 0.5, %v873_v35  ;;  %v1467_v60 = vld [vmem:[%s2082_s1 + $0x8] ss:$16 sps:$4 sm:$0xff]   ;;  %v1468_v63 = vld [vmem:[%s2082_s1 + $0x24] ss:$16 sps:$4 sm:$0xff]  }
 0x50f   :  { %v1471_v35 = vld [vmem:[%s2082_s1 + $0x28] ss:$16 sps:$4 sm:$0xff]  }
 0x510   :  { %1426 = vtanh.f32 %v863_v2  ;;  %v1469_v2 = vld [vmem:[%s2082_s1 + $0x2c] ss:$16 sps:$4 sm:$0xff]  }
 0x511   :  { %1428 = vtanh.f32 %v867_v34  ;;  %v1470_v34 = vld [vmem:[%s2082_s1 + $0x20] ss:$16 sps:$4 sm:$0xff]  }
 0x512   :  { %1430 = vtanh.f32 %v875_v62  ;;  %v1472_v62 = vld [vmem:[%s2082_s1 + $0x44] ss:$16 sps:$4 sm:$0xff]  }
 0x518   :  { %v1425_v36 = vpop.eup %1424 }
 0x519   :  { %v858_v37 = vmul.f32 0.5, %v1425_v36  ;;  %v1473_v36 = vld [vmem:[%s2082_s1 + $0x4c] ss:$16 sps:$4 sm:$0xff]  }
 0x51a   :  { %v1427_v53 = vpop.eup %1426 }
 0x51b   :  { %v859_v39 = vadd.f32 0.5, %v858_v37  ;;  %v865_v40 = vmul.f32 0.5, %v1427_v53  ;;  %v1429_v42 = vpop.eup %1428  ;;  %v1475_v37 = vld [vmem:[%s2082_s1 + $0x48] ss:$16 sps:$4 sm:$0xff]   ;;  %v1476_v53 = vld [vmem:[%s2082_s1 + $0x64] ss:$16 sps:$4 sm:$0xff]  }
 0x51c   :  { %v1431_v48 = vpop.eup %1430 }
 0x51d   :  { %v866_v41 = vadd.f32 0.5, %v865_v40  ;;  %v871_v47 = vmul.f32 %v1429_v42, %v859_v39  ;;  %v877_v49 = vmul.f32 0.5, %v1431_v48  ;;  %v1477_v39 = vld [vmem:[%s2082_s1 + $0x6c] ss:$16 sps:$4 sm:$0xff]   ;;  %v1478_v40 = vld [vmem:[%s2082_s1 + $0x60] ss:$16 sps:$4 sm:$0xff]  }
 0x51e   :  { %v1480_v42 = vld [vmem:[%s2082_s1 + $0x84] ss:$16 sps:$4 sm:$0xff]  }
 0x51f   :  { %v870_v46 = vmul.f32 %v866_v41, %v1882_v38  ;;  %v878_v50 = vadd.f32 0.5, %v877_v49  ;;  %v1479_v41 = vld [vmem:[%s2082_s1 + $0x68] ss:$16 sps:$4 sm:$0xff]   ;;  %v1484_v48 = vld [vmem:[%s2082_s1 + $0xa4] ss:$16 sps:$4 sm:$0xff]  }
 0x520   :  { %v1485_v49 = vld [vmem:[%s2082_s1 + $0xac] ss:$16 sps:$4 sm:$0xff]  }
 0x521   :  { %v1928_v61 = vadd.f32 %v871_v47, %v870_v46  ;;  %v1481_v46 = vld [vmem:[%s2082_s1 + $0x8c] ss:$16 sps:$4 sm:$0xff]   ;;  %v1482_v47 = vld [vmem:[%s2082_s1 + $0x80] ss:$16 sps:$4 sm:$0xff]  }
 0x523   :  { %1432 = vtanh.f32 %v1928_v61 }
 0x52d   :  { %v1433_v51 = vpop.eup %1432 }
 0x52e   :  { %v880_v52 = vmul.f32 %v1433_v51, %v878_v50  ;;  %v1486_v50 = vld [vmem:[%s2082_s1 + $0xa0] ss:$16 sps:$4 sm:$0xff]   ;;  %v1487_v51 = vld [vmem:[%s2082_s1 + $0xa8] ss:$16 sps:$4 sm:$0xff]  }
 0x530   :  { %v881_v54 = vpack.c.bf16 %v880_v52, %v880_v52  ;;  %v1488_v52 = vld [vmem:[%s2082_s1 + $0xc4] ss:$16 sps:$4 sm:$0xff]  }
 0x532   :  { %918 = vmatmul.mubr.bf16.vlgmr.msra.gmra.mrb[20].mxu0 %v881_v54  ;;  %959 = vmatmul.mubr.bf16.vlgmr.msra.gmra.mrb[20].mxu1 %v881_v54  ;;  %v1489_v54 = vld [vmem:[%s2082_s1 + $0xcc] ss:$16 sps:$4 sm:$0xff]  }
 0x533   :  { %1020 = vmatpush1.bf16.msra.mxu0 %v1530_v4  ;;  %1061 = vmatpush1.bf16.msra.mxu1 %v1535_v5  ;;  %v1464_v4 = vld [vmem:[%s2082_s1 + $0x4] ss:$16 sps:$4 sm:$0xff]   ;;  %v1465_v5 = vld [vmem:[%s2082_s1 + $0xc] ss:$16 sps:$4 sm:$0xff]  }
 0x534   :  { %1021 = vmatprep.subr.bf16.mxu0 %v1541_v6  ;;  %1062 = vmatprep.subr.bf16.mxu1 %v1548_v7 }
 0x535   :  { %1051 = vmatprep.mubr.bf16.mxu0 %v1496_v1  ;;  %1092 = vmatprep.mubr.bf16.mxu1 %v1496_v1 }
 0x537   :  { %1022 = vmatpush1.bf16.msra.mxu0 %v1553_v8  ;;  %1063 = vmatpush1.bf16.msra.mxu1 %v1559_v9 }
 0x538   :  { %1023 = vmatprep.subr.bf16.mxu0 %v1565_v10  ;;  %1064 = vmatprep.subr.bf16.mxu1 %v1570_v11 }
 0x53b   :  { %1024 = vmatpush1.bf16.msra.mxu0 %v1575_v12  ;;  %1065 = vmatpush1.bf16.msra.mxu1 %v1580_v13 }
 0x53c   :  { %1025 = vmatprep.subr.bf16.mxu0 %v1587_v14  ;;  %1066 = vmatprep.subr.bf16.mxu1 %v1594_v15 }
 0x53f   :  { %1026 = vmatpush1.bf16.msra.mxu0 %v1599_v16  ;;  %1067 = vmatpush1.bf16.msra.mxu1 %v1606_v17  ;;  %v884_v17 = vunpack.c.h.bf16 %v1922_v45 }
 0x540   :  { %1027 = vmatprep.subr.bf16.mxu0 %v1611_v18  ;;  %1068 = vmatprep.subr.bf16.mxu1 %v1618_v19 }
 0x543   :  { %1028 = vmatpush1.bf16.msra.mxu0 %v1623_v20  ;;  %1069 = vmatpush1.bf16.msra.mxu1 %v1628_v21 }
 0x544   :  { %1029 = vmatprep.subr.bf16.mxu0 %v1635_v22  ;;  %1070 = vmatprep.subr.bf16.mxu1 %v1642_v23 }
 0x547   :  { %1030 = vmatpush1.bf16.msra.mxu0 %v1649_v24  ;;  %1071 = vmatpush1.bf16.msra.mxu1 %v1654_v25 }
 0x548   :  { %1031 = vmatprep.subr.bf16.mxu0 %v1661_v26  ;;  %1072 = vmatprep.subr.bf16.mxu1 %v1666_v27 }
 0x54b   :  { %1032 = vmatpush1.bf16.msra.mxu0 %v1673_v28  ;;  %1073 = vmatpush1.bf16.msra.mxu1 %v1678_v29 }
 0x54c   :  { %1033 = vmatprep.subr.bf16.mxu0 %v1685_v30  ;;  %1074 = vmatprep.subr.bf16.mxu1 %v1690_v31 }
 0x54f   :  { %1034 = vmatpush1.bf16.msra.mxu0 %v1697_v32  ;;  %1075 = vmatpush1.bf16.msra.mxu1 %v1702_v33 }
 0x550   :  { %1153 = vmatprep.subr.bf16.mxu0 %v1464_v4  ;;  %1194 = vmatprep.subr.bf16.mxu1 %v1465_v5  ;;  %v1490_v4 = vld [vmem:[%s2082_s1 + $0xc0] ss:$16 sps:$4 sm:$0xff]   ;;  %v1491_v5 = vld [vmem:[%s2082_s1 + $0xc8] ss:$16 sps:$4 sm:$0xff]  }
 0x605   :  { %v919_v6 = vpop.f32.mrb[20].mxu0  ;;  %v960_v7 = vpop.f32.mrb[20].mxu1 }
 0x606   :  { %v921_v8 = vpop.f32.mrb[21].mxu0  ;;  %v962_v9 = vpop.f32.mrb[21].mxu1 }
 0x607   :  { %v971_v10 = vcombine.low %v919_v6, %v921_v8  ;;  %v972_v11 = vcombine.low %v960_v7, %v962_v9  ;;  %v923_v12 = vpop.f32.mrb[22].mxu0  ;;  %v964_v13 = vpop.f32.mrb[22].mxu1  ;;  %v1492_v6 = vld [vmem:[%s2082_s1 + $0xe4] ss:$16 sps:$4 sm:$0xff]   ;;  %v1493_v7 = vld [vmem:[%s2082_s1 + $0xec] ss:$16 sps:$4 sm:$0xff]  }
 0x608   :  { %v924_v14 = vpop.f32.mrb[23].mxu0  ;;  %v965_v15 = vpop.f32.mrb[23].mxu1  ;;  %v1494_v8 = vld [vmem:[%s2082_s1 + $0xe0] ss:$16 sps:$4 sm:$0xff]   ;;  %v1495_v9 = vld [vmem:[%s2082_s1 + $0xe8] ss:$16 sps:$4 sm:$0xff]  }
 0x609   :  { %v979_v16 = vrot.slane %v971_v10, %v1744_v43  ;;  %v986_v18 = vrot.slane %v972_v11, %v1744_v43  ;;  %v1331_v13 = vld [vmem:[%s2083_s0 + $0x18] sm:$0xf] }
 0x60b   :  { %v987_v19 = vcombine.low %v979_v16, %v986_v18 }
 0x60d   :  { %v989_v20 = vadd.f32 %v987_v19, %v884_v17 }
 0x60f   :  { %v990_v21 = vmul.f32 0.5, %v989_v20  ;;  %v995_v22 = vrot.slane %v989_v20, 2  ;;  %v1001_v24 = vrot.slane %v989_v20, 4  ;;  %v1007_v25 = vrot.slane %v989_v20, 6 }
 0x611   :  { %1434 = vtanh.f32 %v990_v21  ;;  %v997_v23 = vmul.f32 0.5, %v995_v22  ;;  %v1009_v26 = vmul.f32 0.5, %v1007_v25  ;;  %v1018_v22 = vunpack.c.l.bf16 %v1331_v13 }
 0x613   :  { %1436 = vtanh.f32 %v997_v23 }
 0x614   :  { %1438 = vtanh.f32 %v1001_v24 }
 0x615   :  { %1440 = vtanh.f32 %v1009_v26 }
 0x61b   :  { %v1435_v27 = vpop.eup %1434 }
 0x61c   :  { %v992_v28 = vmul.f32 0.5, %v1435_v27 }
 0x61d   :  { %v1437_v29 = vpop.eup %1436 }
 0x61e   :  { %v993_v30 = vadd.f32 0.5, %v992_v28  ;;  %v999_v31 = vmul.f32 0.5, %v1437_v29  ;;  %v1439_v33 = vpop.eup %1438 }
 0x61f   :  { %v1441_v56 = vpop.eup %1440 }
 0x620   :  { %v1000_v32 = vadd.f32 0.5, %v999_v31  ;;  %v1005_v45 = vmul.f32 %v1439_v33, %v993_v30  ;;  %v1011_v57 = vmul.f32 0.5, %v1441_v56 }
 0x622   :  { %v1004_v38 = vmul.f32 %v1000_v32, %v1928_v61  ;;  %v1012_v58 = vadd.f32 0.5, %v1011_v57  ;;  %v1483_v61 = vld [vmem:[%s2082_s1 + $0x88] ss:$16 sps:$4 sm:$0xff]  }
 0x624   :  { %v1973_v55 = vadd.f32 %v1005_v45, %v1004_v38 }
 0x626   :  { %1442 = vtanh.f32 %v1973_v55 }
 0x630   :  { %v1443_v0 = vpop.eup %1442 }
 0x631   :  { %v1014_v3 = vmul.f32 %v1443_v0, %v1012_v58 }
 0x633   :  { %v1015_v59 = vpack.c.bf16 %v1014_v3, %v1014_v3 }
 0x635   :  { %1052 = vmatmul.mubr.bf16.vlgmr.msra.gmra.mrb[24].mxu0 %v1015_v59  ;;  %1093 = vmatmul.mubr.bf16.vlgmr.msra.gmra.mrb[24].mxu1 %v1015_v59 }
 0x636   :  { %1154 = vmatpush1.bf16.msra.mxu0 %v1466_v44  ;;  %1195 = vmatpush1.bf16.msra.mxu1 %v1467_v60 }
 0x637   :  { %1155 = vmatprep.subr.bf16.mxu0 %v1468_v63  ;;  %1196 = vmatprep.subr.bf16.mxu1 %v1469_v2 }
 0x638   :  { %1185 = vmatprep.mubr.bf16.mxu0 %v1496_v1  ;;  %1226 = vmatprep.mubr.bf16.mxu1 %v1496_v1  ;;  %v1474_v1 = vld [vmem:[%s2082_s1 + $0x40] ss:$16 sps:$4 sm:$0xff]  }
 0x63a   :  { %1156 = vmatpush1.bf16.msra.mxu0 %v1470_v34  ;;  %1197 = vmatpush1.bf16.msra.mxu1 %v1471_v35 }
 0x63b   :  { %1157 = vmatprep.subr.bf16.mxu0 %v1472_v62  ;;  %1198 = vmatprep.subr.bf16.mxu1 %v1473_v36 }
 0x63e   :  { %1158 = vmatpush1.bf16.msra.mxu0 %v1474_v1  ;;  %1199 = vmatpush1.bf16.msra.mxu1 %v1475_v37  ;;  %v1332_v37 = vld [vmem:[%s2083_s0 + $0x1c] sm:$0xf] }
 0x63f   :  { %1159 = vmatprep.subr.bf16.mxu0 %v1476_v53  ;;  %1200 = vmatprep.subr.bf16.mxu1 %v1477_v39 }
 0x642   :  { %1160 = vmatpush1.bf16.msra.mxu0 %v1478_v40  ;;  %1201 = vmatpush1.bf16.msra.mxu1 %v1479_v41 }
 0x643   :  { %1161 = vmatprep.subr.bf16.mxu0 %v1480_v42  ;;  %1202 = vmatprep.subr.bf16.mxu1 %v1481_v46 }
 0x646   :  { %1162 = vmatpush1.bf16.msra.mxu0 %v1482_v47  ;;  %1203 = vmatpush1.bf16.msra.mxu1 %v1483_v61  ;;  %v1152_v61 = vunpack.c.l.bf16 %v1332_v37 }
 0x647   :  { %1163 = vmatprep.subr.bf16.mxu0 %v1484_v48  ;;  %1204 = vmatprep.subr.bf16.mxu1 %v1485_v49 }
 0x64a   :  { %1164 = vmatpush1.bf16.msra.mxu0 %v1486_v50  ;;  %1205 = vmatpush1.bf16.msra.mxu1 %v1487_v51 }
 0x64b   :  { %1165 = vmatprep.subr.bf16.mxu0 %v1488_v52  ;;  %1206 = vmatprep.subr.bf16.mxu1 %v1489_v54 }
 0x64e   :  { %1166 = vmatpush1.bf16.msra.mxu0 %v1490_v4  ;;  %1207 = vmatpush1.bf16.msra.mxu1 %v1491_v5 }
 0x64f   :  { %1167 = vmatprep.subr.bf16.mxu0 %v1492_v6  ;;  %1208 = vmatprep.subr.bf16.mxu1 %v1493_v7 }
 0x652   :  { %1168 = vmatpush1.bf16.msra.mxu0 %v1494_v8  ;;  %1209 = vmatpush1.bf16.msra.mxu1 %v1495_v9 }
 0x708   :  { %v1053_v10 = vpop.f32.mrb[24].mxu0  ;;  %v1094_v11 = vpop.f32.mrb[24].mxu1 }
 0x709   :  { %v1055_v12 = vpop.f32.mrb[25].mxu0  ;;  %v1096_v14 = vpop.f32.mrb[25].mxu1 }
 0x70a   :  { %v1105_v15 = vcombine.low %v1053_v10, %v1055_v12  ;;  %v1106_v16 = vcombine.low %v1094_v11, %v1096_v14  ;;  %v1057_v17 = vpop.f32.mrb[26].mxu0  ;;  %v1098_v18 = vpop.f32.mrb[26].mxu1 }
 0x70b   :  { %v1058_v19 = vpop.f32.mrb[27].mxu0  ;;  %v1099_v20 = vpop.f32.mrb[27].mxu1 }
 0x70c   :  { %v1113_v21 = vrot.slane %v1105_v15, %v1744_v43  ;;  %v1120_v23 = vrot.slane %v1106_v16, %v1744_v43 }
 0x70e   :  { %v1121_v24 = vcombine.low %v1113_v21, %v1120_v23 }
 0x710   :  { %v1123_v25 = vadd.f32 %v1121_v24, %v1018_v22 }
 0x712   :  { %v1124_v26 = vmul.f32 0.5, %v1123_v25  ;;  %v1129_v27 = vrot.slane %v1123_v25, 2  ;;  %v1135_v29 = vrot.slane %v1123_v25, 4  ;;  %v1141_v30 = vrot.slane %v1123_v25, 6 }
 0x714   :  { %1444 = vtanh.f32 %v1124_v26  ;;  %v1131_v28 = vmul.f32 0.5, %v1129_v27  ;;  %v1143_v31 = vmul.f32 0.5, %v1141_v30 }
 0x716   :  { %1446 = vtanh.f32 %v1131_v28 }
 0x717   :  { %1448 = vtanh.f32 %v1135_v29 }
 0x718   :  { %1450 = vtanh.f32 %v1143_v31 }
 0x71e   :  { %v1445_v32 = vpop.eup %1444 }
 0x71f   :  { %v1126_v33 = vmul.f32 0.5, %v1445_v32 }
 0x720   :  { %v1447_v38 = vpop.eup %1446 }
 0x721   :  { %v1127_v45 = vadd.f32 0.5, %v1126_v33  ;;  %v1133_v56 = vmul.f32 0.5, %v1447_v38  ;;  %v1449_v58 = vpop.eup %1448 }
 0x722   :  { %v1451_v44 = vpop.eup %1450 }
 0x723   :  { %v1134_v57 = vadd.f32 0.5, %v1133_v56  ;;  %v1139_v3 = vmul.f32 %v1449_v58, %v1127_v45  ;;  %v1145_v60 = vmul.f32 0.5, %v1451_v44 }
 0x725   :  { %v1138_v0 = vmul.f32 %v1134_v57, %v1973_v55  ;;  %v1146_v63 = vadd.f32 0.5, %v1145_v60 }
 0x727   :  { %v1140_v59 = vadd.f32 %v1139_v3, %v1138_v0 }
 0x729   :  { %1452 = vtanh.f32 %v1140_v59 }
 0x733   :  { %v1453_v2 = vpop.eup %1452 }
 0x734   :  { %v1148_v34 = vmul.f32 %v1453_v2, %v1146_v63 }
 0x736   :  { %v1149_v35 = vpack.c.bf16 %v1148_v34, %v1148_v34 }
 0x738   :  { %1186 = vmatmul.mubr.bf16.vlgmr.msra.gmra.mrb[28].mxu0 %v1149_v35  ;;  %1227 = vmatmul.mubr.bf16.vlgmr.msra.gmra.mrb[28].mxu1 %v1149_v35 }
 0x80b   :  { %v1187_v62 = vpop.f32.mrb[28].mxu0  ;;  %v1228_v36 = vpop.f32.mrb[28].mxu1 }
 0x80c   :  { %v1189_v1 = vpop.f32.mrb[29].mxu0  ;;  %v1230_v53 = vpop.f32.mrb[29].mxu1 }
 0x80d   :  { %v1239_v55 = vcombine.low %v1187_v62, %v1189_v1  ;;  %v1240_v39 = vcombine.low %v1228_v36, %v1230_v53  ;;  %v1191_v40 = vpop.f32.mrb[30].mxu0  ;;  %v1232_v41 = vpop.f32.mrb[30].mxu1 }
 0x80e   :  { %v1192_v42 = vpop.f32.mrb[31].mxu0  ;;  %v1233_v46 = vpop.f32.mrb[31].mxu1 }
 0x80f   :  { %v1247_v47 = vrot.slane %v1239_v55, %v1744_v43  ;;  %v1254_v48 = vrot.slane %v1240_v39, %v1744_v43 }
 0x811   :  { %v1255_v49 = vcombine.low %v1247_v47, %v1254_v48 }
 0x813   :  { %v1257_v50 = vadd.f32 %v1255_v49, %v1152_v61 }
 0x815   :  { %v1258_v51 = vmul.f32 0.5, %v1257_v50  ;;  %v1263_v52 = vrot.slane %v1257_v50, 2  ;;  %v1269_v4 = vrot.slane %v1257_v50, 4  ;;  %v1275_v5 = vrot.slane %v1257_v50, 6 }
 0x817   :  { %1454 = vtanh.f32 %v1258_v51  ;;  %v1265_v54 = vmul.f32 0.5, %v1263_v52  ;;  %v1277_v6 = vmul.f32 0.5, %v1275_v5 }
 0x819   :  { %1456 = vtanh.f32 %v1265_v54 }
 0x81a   :  { %1458 = vtanh.f32 %v1269_v4 }
 0x81b   :  { %1460 = vtanh.f32 %v1277_v6 }
 0x821   :  { %v1455_v7 = vpop.eup %1454 }
 0x822   :  { %v1260_v8 = vmul.f32 0.5, %v1455_v7 }
 0x823   :  { %v1457_v9 = vpop.eup %1456 }
 0x824   :  { %v1261_v10 = vadd.f32 0.5, %v1260_v8  ;;  %v1267_v11 = vmul.f32 0.5, %v1457_v9  ;;  %v1459_v13 = vpop.eup %1458 }
 0x825   :  { %v1461_v16 = vpop.eup %1460 }
 0x826   :  { %v1268_v12 = vadd.f32 0.5, %v1267_v11  ;;  %v1273_v14 = vmul.f32 %v1459_v13, %v1261_v10  ;;  %v1279_v17 = vmul.f32 0.5, %v1461_v16 }
 0x828   :  { %v1272_v43 = vmul.f32 %v1268_v12, %v1140_v59  ;;  %v1280_v18 = vadd.f32 0.5, %v1279_v17 }
 0x82a   :  { %v1274_v15 = vadd.f32 %v1273_v14, %v1272_v43 }
 0x82c   :  { %1462 = vtanh.f32 %v1274_v15  ;;  %1284 = vst [vmem:[#allocation3] sm:$0x3] %v1274_v15 }
 0x836   :  { %v1463_v19 = vpop.eup %1462 }
 0x837   :  { %v1282_v20 = vmul.f32 %v1463_v19, %v1280_v18 }
 0x839   :  { %1283 = vst [vmem:[#allocation2] sm:$0x3] %v1282_v20 }
 0x840   :  { %v1288_v21 = vld [vmem:[#allocation2] sm:$0x3] }
 0x841   :  { %1289 = vst [vmem:[%s2084_s2] sm:$0x3] %v1288_v21 }

</bundles_post_ra>
